<compile_context>
chip_gen: v6e
topology: v6e:2x2x1
jax: 0.10.0
libtpu: 0.0.40
codegen_flags: <defaults>
</compile_context>

<pallas_src>
import jax
import jax.numpy as jnp
import numpy as np
from jax import lax
from jax.experimental import pallas as pl
from jax.experimental.pallas import tpu as pltpu


def _make_ncde_kernel(L, output_time, input_channels):
    """RK4 (torchdiffeq '3/8' rule, one step per knot interval) integration of
    the ContinuousRNNConverter CDE plus the final linear layer.

    State layout: (TB, H) with batch on sublanes, hidden channels on lanes,
    H = input_channels + hidden_channels.  The control derivative arrives
    pre-scaled by dt and embedded in lanes [0, input_channels).
    """
    window_start = L - output_time
    C = input_channels

    def kernel(dxe_ref, wbig_ref, bbig_ref, wlin_ref, blin_ref,
               pred_ref, zbuf_ref):
        TB = dxe_ref.shape[2]
        H = dxe_ref.shape[3]

        # Hoisted constants (avoid re-broadcasting inside the unrolled loop).
        hmask = lax.broadcasted_iota(jnp.int32, (TB, H), 1) >= C
        wbig = wbig_ref[...]                                   # (H, H)
        bbig = jnp.broadcast_to(bbig_ref[...], (TB, H))        # (TB, H)

        def kf(z, d):
            # d = dt * dX/dt embedded in lanes [0, C); h lanes are zero.
            # ContinuousRNNConverter vector field:
            #   dz_x = dX/dt ; dz_h = model(x, clamp(h)) * dX/dt[..., 0]
            # wbig/bbig have exact zeros in their first C output columns, so
            # tanh() is exactly 0 on the x lanes and a single fused matmul +
            # one FMA builds the whole (already dt-scaled) increment.
            zc = jnp.where(hmask, jnp.clip(z, -1.0, 1.0), z)
            # TODO(synk): on v5e/v6e a VPU broadcast-FMA chain could replace
            # this small-K MXU round trip; kept on the MXU for clarity.
            m = jnp.tanh(jnp.dot(zc, wbig, preferred_element_type=jnp.float32)
                         + bbig)
            return d + m * d[:, 0:1]

        def store_state(i, zn):
            # Pre-window states are clamped onto row 0 and overwritten later;
            # this avoids a lax.cond inside the serial integration loop.
            if isinstance(i, int):                 # statically unrolled path
                if i + 1 >= window_start:
                    zbuf_ref[i + 1 - window_start] = zn
            else:                                  # fori_loop path
                zbuf_ref[jnp.maximum(i + 1 - window_start, 0)] = zn

        def step(i, z):
            d1 = dxe_ref[i, 0]
            d2 = dxe_ref[i, 1]
            d3 = dxe_ref[i, 2]
            d4 = dxe_ref[i, 3]
            # torchdiffeq method='rk4' fixed-grid step (3/8 rule); dt has been
            # folded into d1..d4, so every k_i here is dt * k_i.
            k1 = kf(z, d1)
            k2 = kf(z + k1 * (1.0 / 3.0), d2)
            k3 = kf(z + (k2 - k1 * (1.0 / 3.0)), d3)
            k4 = kf(z + (k1 - k2 + k3), d4)
            zn = z + 0.125 * (k1 + 3.0 * (k2 + k3) + k4)
            store_state(i, zn)
            return zn

        z0 = jnp.zeros((TB, H), jnp.float32)
        if window_start == 0:            # static: window includes z at times[0]
            zbuf_ref[0] = z0

        if L - 1 <= 32:
            # Full unroll: gives the scheduler visibility across stages/steps.
            z = z0
            for i in range(L - 1):
                z = step(i, z)
        else:
            lax.fori_loop(0, L - 1, step, z0, unroll=4)

        # Final linear hoisted out of the integration loop: a few independent
        # matmuls on the stored window, off the serial RK4 critical path.
        wlin = wlin_ref[...]
        blin = blin_ref[...]
        for t in range(output_time):
            pred_ref[t] = (jnp.dot(zbuf_ref[t], wlin,
                                   preferred_element_type=jnp.float32) + blin)

    return kernel


def neural_cde_forecasting(times, coeffs, final_index, params, output_time):
    """stream=True path of NeuralCDE_forecasting.forward with
    func=ContinuousRNNConverter (z0 = zeros; `final_index` is ignored)."""
    a, b, two_c, three_d = coeffs                  # each (B, L-1, C)
    del a, final_index                             # 'a' unused by derivative
    times = jnp.asarray(times, jnp.float32)
    L = int(times.shape[0])
    B, nseg, C = b.shape
    Hh = int(params["wh"].shape[0])
    H = C + Hh
    assert 1 <= output_time <= L

    dt = times[1:] - times[:-1]                    # (L-1,)
    # torchdiffeq rk4 uses step_size = min(dt); with uniformly spaced `times`
    # the integration grid coincides with `times` (one RK4 step per interval).
    # TODO(synk): non-uniform `times` needs torchdiffeq's grid_constructor plus
    # interpolation of outputs back onto `times`; not implemented here.

    # ---- precompute dt * dX/dt at the four RK4 stage times (outside kernel) --
    teval = jnp.stack([times[:-1],
                       times[:-1] + dt / 3.0,
                       times[:-1] + 2.0 * dt / 3.0,
                       times[1:]], axis=1)          # (L-1, 4) stage times
    maxlen = nseg - 1
    idx = jnp.clip(
        jnp.sum(teval[:, :, None] > times[None, None, :], axis=-1) - 1,
        0, maxlen)                                  # (L-1, 4) spline segments
    fr = (teval - times[idx])[None, :, :, None].astype(jnp.float32)
    dxdt = (b[:, idx, :].astype(jnp.float32)
            + (two_c[:, idx, :].astype(jnp.float32)
               + three_d[:, idx, :].astype(jnp.float32) * fr) * fr)  # (B,L-1,4,C)
    dxdt = dxdt * dt[None, :, None, None]           # fold dt into the stages
    dxdt = jnp.transpose(dxdt, (1, 2, 0, 3))        # (L-1, 4, B, C) step-major

    # Batch tiling: pad B to a sublane multiple; grid over batch tiles so the
    # two TensorCores on v7x split the work and per-core VMEM stays bounded.
    TB = 64 if B >= 64 else ((B + 7) // 8) * 8
    B_pad = ((B + TB - 1) // TB) * TB
    # Embed dX/dt into the first C lanes of the H-wide state tile.
    dxe = jnp.pad(dxdt, ((0, 0), (0, 0), (0, B_pad - B), (0, Hh)))  # (L-1,4,B_pad,H)

    # ---- fuse the model weights into one H x H contraction ------------------
    wx = params["wx"].astype(jnp.float32)           # (C, Hh)
    wh = params["wh"].astype(jnp.float32)           # (Hh, Hh)
    bm = params["bm"].astype(jnp.float32)           # (1, Hh)
    wbig = jnp.zeros((H, H), jnp.float32).at[:, C:].set(
        jnp.concatenate([wx, wh], axis=0))
    bbig = jnp.zeros((1, H), jnp.float32).at[:, C:].set(bm)
    wlin = params["wlin"].astype(jnp.float32)       # (H, C)
    blin = params["blin"].astype(jnp.float32)       # (1, C)

    kernel = _make_ncde_kernel(L, output_time, C)
    pred = pl.pallas_call(
        kernel,
        out_shape=jax.ShapeDtypeStruct((output_time, B_pad, C), jnp.float32),
        grid_spec=pltpu.PrefetchScalarGridSpec(
            num_scalar_prefetch=0,
            grid=(B_pad // TB,),
            in_specs=[
                pl.BlockSpec((L - 1, 4, TB, H), lambda bb: (0, 0, bb, 0)),
                pl.BlockSpec((H, H), lambda bb: (0, 0)),
                pl.BlockSpec((1, H), lambda bb: (0, 0)),
                pl.BlockSpec((H, C), lambda bb: (0, 0)),
                pl.BlockSpec((1, C), lambda bb: (0, 0)),
            ],
            out_specs=pl.BlockSpec((output_time, TB, C), lambda bb: (0, bb, 0)),
            scratch_shapes=[pltpu.VMEM((output_time, TB, H), jnp.float32)],
        ),
        compiler_params=pltpu.CompilerParams(
            dimension_semantics=("parallel",)),
    )(dxe, wbig, bbig, wlin, blin)
    # TODO(synk): for very large L the (L-1, 4, TB, H) block should also be
    # tiled along the time axis (extra "arbitrary" grid dim with the state
    # carried in scratch) to stay within v7x's 64 MiB VMEM.
    return jnp.transpose(pred[:, :B, :], (1, 0, 2))  # (B, output_time, C)


def reference_forward(times, coeffs, params, output_time):
    """Pure-JAX mirror of the PyTorch forward (stream=True, ContinuousRNNConverter)."""
    a, b, two_c, three_d = coeffs
    L = int(times.shape[0])
    B, nseg, C = b.shape
    Hh = params["wh"].shape[0]
    wx, wh, bm = params["wx"], params["wh"], params["bm"]
    wlin, blin = params["wlin"], params["blin"]
    maxlen = nseg - 1

    def deriv(t):
        index = jnp.clip(jnp.sum(t > times) - 1, 0, maxlen)
        fr = t - times[index]
        return b[:, index, :] + (two_c[:, index, :] + three_d[:, index, :] * fr) * fr

    def vf(z, dx):
        zx, zh = z[:, :C], z[:, C:]
        h = jnp.clip(zh, -1.0, 1.0)
        m = jnp.tanh(zx @ wx + h @ wh + bm)
        return jnp.concatenate([dx, m * dx[:, 0:1]], axis=-1)

    z = jnp.zeros((B, C + Hh), jnp.float32)
    zs = [z]
    for i in range(L - 1):
        t0, t1 = times[i], times[i + 1]
        dti = t1 - t0
        k1 = vf(z, deriv(t0))
        k2 = vf(z + dti * k1 / 3.0, deriv(t0 + dti / 3.0))
        k3 = vf(z + dti * (k2 - k1 / 3.0), deriv(t0 + 2.0 * dti / 3.0))
        k4 = vf(z + dti * (k1 - k2 + k3), deriv(t1))
        z = z + dti * 0.125 * (k1 + 3.0 * (k2 + k3) + k4)
        zs.append(z)
    zt = jnp.stack(zs, axis=1)                      # (B, L, H)
    window = zt[:, L - output_time:, :]
    return window @ wlin + blin


if __name__ == "__main__":
    B, C, Hh, L, output_time = 4, 4, 12, 8, 4       # hidden total H = C + Hh = 16
    key = jax.random.PRNGKey(0)
    ks = jax.random.split(key, 9)

    times = jnp.arange(L, dtype=jnp.float32) * 0.5
    a = jax.random.normal(ks[0], (B, L - 1, C), jnp.float32) * 0.5
    b = jax.random.normal(ks[1], (B, L - 1, C), jnp.float32) * 0.5
    two_c = jax.random.normal(ks[2], (B, L - 1, C), jnp.float32) * 0.5
    three_d = jax.random.normal(ks[3], (B, L - 1, C), jnp.float32) * 0.5
    coeffs = (a, b, two_c, three_d)
    final_index = jnp.full((B,), L - 1, jnp.int32)  # ignored (stream=True path)

    params = {
        # ContinuousRNNConverter.model: deterministic stand-in cell
        #   model(x, h) = tanh(x @ wx + h @ wh + bm)
        "wx": jax.random.normal(ks[4], (C, Hh), jnp.float32) * 0.3,
        "wh": jax.random.normal(ks[5], (Hh, Hh), jnp.float32) * 0.3,
        "bm": jax.random.normal(ks[6], (1, Hh), jnp.float32) * 0.1,
        # self.linear: Linear(hidden_channels = C + Hh, input_channels = C)
        "wlin": jax.random.normal(ks[7], (C + Hh, C), jnp.float32) * 0.3,
        "blin": jax.random.normal(ks[8], (1, C), jnp.float32) * 0.1,
    }

    pred = neural_cde_forecasting(times, coeffs, final_index, params, output_time)
    pred = jax.block_until_ready(pred)

    ref = reference_forward(times, coeffs, params, output_time)
    assert pred.shape == (B, output_time, C)
    np.testing.assert_allclose(np.asarray(pred), np.asarray(ref),
                               rtol=2e-3, atol=2e-3)
    print("KERNEL_OK")
</pallas_src>

<mosaic_0001>
module attributes {stable_mosaic.version = 11 : i64} {
  func.func @kernel(%arg0: i32, %arg1: memref<7x4x8x16xf32, #tpu.memory_space<vmem>>, %arg2: memref<16x16xf32, #tpu.memory_space<vmem>>, %arg3: memref<1x16xf32, #tpu.memory_space<vmem>>, %arg4: memref<16x4xf32, #tpu.memory_space<vmem>>, %arg5: memref<1x4xf32, #tpu.memory_space<vmem>>, %arg6: memref<4x8x4xf32, #tpu.memory_space<vmem>>, %arg7: memref<4x8x16xf32, #tpu.memory_space<vmem>>) attributes {dimension_semantics = [#tpu.dimension_semantics<parallel>], iteration_bounds = array<i64: 1>, scalar_prefetch = 0 : i64, scratch_operands = 1 : i64, tpu.core_type = #tpu.core_type<tc>, window_params = [{transform_indices = @transform_0, window_bounds = array<i64: 7, 4, 8, 16>}, {pipeline_mode = #tpu.pipeline_mode<synchronous>, transform_indices = @transform_1, window_bounds = array<i64: 16, 16>}, {pipeline_mode = #tpu.pipeline_mode<synchronous>, transform_indices = @transform_2, window_bounds = array<i64: 1, 16>}, {pipeline_mode = #tpu.pipeline_mode<synchronous>, transform_indices = @transform_3, window_bounds = array<i64: 16, 4>}, {pipeline_mode = #tpu.pipeline_mode<synchronous>, transform_indices = @transform_4, window_bounds = array<i64: 1, 4>}, {transform_indices = @transform_5, window_bounds = array<i64: 4, 8, 4>}]} {
    %0 = tpu.iota {dimensions = array<i32: 1>} : vector<8x16xi32>
    %c4_i32 = arith.constant 4 : i32
    %1 = vector.broadcast %c4_i32 : i32 to vector<8x16xi32>
    %2 = arith.cmpi sge, %0, %1 : vector<8x16xi32>
    %c0 = arith.constant 0 : index
    %c0_0 = arith.constant 0 : index
    %3 = vector.load %arg2[%c0, %c0_0] : memref<16x16xf32, #tpu.memory_space<vmem>>, vector<16x16xf32>
    %c0_1 = arith.constant 0 : index
    %c0_2 = arith.constant 0 : index
    %4 = vector.load %arg3[%c0_1, %c0_2] : memref<1x16xf32, #tpu.memory_space<vmem>>, vector<1x16xf32>
    %5 = vector.shape_cast %4 : vector<1x16xf32> to vector<1x16xf32>
    %6 = vector.broadcast %5 : vector<1x16xf32> to vector<8x16xf32>
    %cst = arith.constant 0.000000e+00 : f32
    %7 = vector.broadcast %cst : f32 to vector<8x16xf32>
    %c0_3 = arith.constant 0 : index
    %c0_4 = arith.constant 0 : index
    %c0_5 = arith.constant 0 : index
    %c0_6 = arith.constant 0 : index
    %8 = vector.load %arg1[%c0_3, %c0_4, %c0_5, %c0_6] : memref<7x4x8x16xf32, #tpu.memory_space<vmem>>, vector<1x1x8x16xf32>
    %9 = vector.shape_cast %8 : vector<1x1x8x16xf32> to vector<8x16xf32>
    %c0_7 = arith.constant 0 : index
    %c1 = arith.constant 1 : index
    %c0_8 = arith.constant 0 : index
    %c0_9 = arith.constant 0 : index
    %10 = vector.load %arg1[%c0_7, %c1, %c0_8, %c0_9] : memref<7x4x8x16xf32, #tpu.memory_space<vmem>>, vector<1x1x8x16xf32>
    %11 = vector.shape_cast %10 : vector<1x1x8x16xf32> to vector<8x16xf32>
    %c0_10 = arith.constant 0 : index
    %c2 = arith.constant 2 : index
    %c0_11 = arith.constant 0 : index
    %c0_12 = arith.constant 0 : index
    %12 = vector.load %arg1[%c0_10, %c2, %c0_11, %c0_12] : memref<7x4x8x16xf32, #tpu.memory_space<vmem>>, vector<1x1x8x16xf32>
    %13 = vector.shape_cast %12 : vector<1x1x8x16xf32> to vector<8x16xf32>
    %c0_13 = arith.constant 0 : index
    %c3 = arith.constant 3 : index
    %c0_14 = arith.constant 0 : index
    %c0_15 = arith.constant 0 : index
    %14 = vector.load %arg1[%c0_13, %c3, %c0_14, %c0_15] : memref<7x4x8x16xf32, #tpu.memory_space<vmem>>, vector<1x1x8x16xf32>
    %15 = vector.shape_cast %14 : vector<1x1x8x16xf32> to vector<8x16xf32>
    %cst_16 = arith.constant -1.000000e+00 : f32
    %cst_17 = arith.constant 1.000000e+00 : f32
    %16 = vector.broadcast %cst_16 : f32 to vector<8x16xf32>
    %17 = arith.maximumf %16, %7 : vector<8x16xf32>
    %18 = vector.broadcast %cst_17 : f32 to vector<8x16xf32>
    %19 = arith.minimumf %18, %17 : vector<8x16xf32>
    %20 = arith.select %2, %19, %7 : vector<8x16xi1>, vector<8x16xf32>
    %cst_18 = arith.constant dense<0.000000e+00> : vector<8x16xf32>
    %21 = tpu.matmul %20, %3, %cst_18 {dimension_numbers = #tpu.dot_dimension_numbers<[1], [0], [0], [1], [0, 0, 1, 1], [], []>} : vector<8x16xf32>, vector<16x16xf32>, vector<8x16xf32> -> vector<8x16xf32>
    %22 = arith.addf %21, %6 : vector<8x16xf32>
    %23 = math.tanh %22 : vector<8x16xf32>
    %24 = vector.extract_strided_slice %9 {offsets = [0, 0], sizes = [8, 1], strides = [1, 1]} : vector<8x16xf32> to vector<8x1xf32>
    %25 = vector.broadcast %24 : vector<8x1xf32> to vector<8x16xf32>
    %26 = arith.mulf %23, %25 : vector<8x16xf32>
    %27 = arith.addf %9, %26 : vector<8x16xf32>
    %cst_19 = arith.constant 0.333333343 : f32
    %28 = vector.broadcast %cst_19 : f32 to vector<8x16xf32>
    %29 = arith.mulf %27, %28 : vector<8x16xf32>
    %30 = arith.addf %7, %29 : vector<8x16xf32>
    %cst_20 = arith.constant -1.000000e+00 : f32
    %cst_21 = arith.constant 1.000000e+00 : f32
    %31 = vector.broadcast %cst_20 : f32 to vector<8x16xf32>
    %32 = arith.maximumf %31, %30 : vector<8x16xf32>
    %33 = vector.broadcast %cst_21 : f32 to vector<8x16xf32>
    %34 = arith.minimumf %33, %32 : vector<8x16xf32>
    %35 = arith.select %2, %34, %30 : vector<8x16xi1>, vector<8x16xf32>
    %cst_22 = arith.constant dense<0.000000e+00> : vector<8x16xf32>
    %36 = tpu.matmul %35, %3, %cst_22 {dimension_numbers = #tpu.dot_dimension_numbers<[1], [0], [0], [1], [0, 0, 1, 1], [], []>} : vector<8x16xf32>, vector<16x16xf32>, vector<8x16xf32> -> vector<8x16xf32>
    %37 = arith.addf %36, %6 : vector<8x16xf32>
    %38 = math.tanh %37 : vector<8x16xf32>
    %39 = vector.extract_strided_slice %11 {offsets = [0, 0], sizes = [8, 1], strides = [1, 1]} : vector<8x16xf32> to vector<8x1xf32>
    %40 = vector.broadcast %39 : vector<8x1xf32> to vector<8x16xf32>
    %41 = arith.mulf %38, %40 : vector<8x16xf32>
    %42 = arith.addf %11, %41 : vector<8x16xf32>
    %cst_23 = arith.constant 0.333333343 : f32
    %43 = vector.broadcast %cst_23 : f32 to vector<8x16xf32>
    %44 = arith.mulf %27, %43 : vector<8x16xf32>
    %45 = arith.subf %42, %44 : vector<8x16xf32>
    %46 = arith.addf %7, %45 : vector<8x16xf32>
    %cst_24 = arith.constant -1.000000e+00 : f32
    %cst_25 = arith.constant 1.000000e+00 : f32
    %47 = vector.broadcast %cst_24 : f32 to vector<8x16xf32>
    %48 = arith.maximumf %47, %46 : vector<8x16xf32>
    %49 = vector.broadcast %cst_25 : f32 to vector<8x16xf32>
    %50 = arith.minimumf %49, %48 : vector<8x16xf32>
    %51 = arith.select %2, %50, %46 : vector<8x16xi1>, vector<8x16xf32>
    %cst_26 = arith.constant dense<0.000000e+00> : vector<8x16xf32>
    %52 = tpu.matmul %51, %3, %cst_26 {dimension_numbers = #tpu.dot_dimension_numbers<[1], [0], [0], [1], [0, 0, 1, 1], [], []>} : vector<8x16xf32>, vector<16x16xf32>, vector<8x16xf32> -> vector<8x16xf32>
    %53 = arith.addf %52, %6 : vector<8x16xf32>
    %54 = math.tanh %53 : vector<8x16xf32>
    %55 = vector.extract_strided_slice %13 {offsets = [0, 0], sizes = [8, 1], strides = [1, 1]} : vector<8x16xf32> to vector<8x1xf32>
    %56 = vector.broadcast %55 : vector<8x1xf32> to vector<8x16xf32>
    %57 = arith.mulf %54, %56 : vector<8x16xf32>
    %58 = arith.addf %13, %57 : vector<8x16xf32>
    %59 = arith.subf %27, %42 : vector<8x16xf32>
    %60 = arith.addf %59, %58 : vector<8x16xf32>
    %61 = arith.addf %7, %60 : vector<8x16xf32>
    %cst_27 = arith.constant -1.000000e+00 : f32
    %cst_28 = arith.constant 1.000000e+00 : f32
    %62 = vector.broadcast %cst_27 : f32 to vector<8x16xf32>
    %63 = arith.maximumf %62, %61 : vector<8x16xf32>
    %64 = vector.broadcast %cst_28 : f32 to vector<8x16xf32>
    %65 = arith.minimumf %64, %63 : vector<8x16xf32>
    %66 = arith.select %2, %65, %61 : vector<8x16xi1>, vector<8x16xf32>
    %cst_29 = arith.constant dense<0.000000e+00> : vector<8x16xf32>
    %67 = tpu.matmul %66, %3, %cst_29 {dimension_numbers = #tpu.dot_dimension_numbers<[1], [0], [0], [1], [0, 0, 1, 1], [], []>} : vector<8x16xf32>, vector<16x16xf32>, vector<8x16xf32> -> vector<8x16xf32>
    %68 = arith.addf %67, %6 : vector<8x16xf32>
    %69 = math.tanh %68 : vector<8x16xf32>
    %70 = vector.extract_strided_slice %15 {offsets = [0, 0], sizes = [8, 1], strides = [1, 1]} : vector<8x16xf32> to vector<8x1xf32>
    %71 = vector.broadcast %70 : vector<8x1xf32> to vector<8x16xf32>
    %72 = arith.mulf %69, %71 : vector<8x16xf32>
    %73 = arith.addf %15, %72 : vector<8x16xf32>
    %74 = arith.addf %42, %58 : vector<8x16xf32>
    %cst_30 = arith.constant 3.000000e+00 : f32
    %75 = vector.broadcast %cst_30 : f32 to vector<8x16xf32>
    %76 = arith.mulf %75, %74 : vector<8x16xf32>
    %77 = arith.addf %27, %76 : vector<8x16xf32>
    %78 = arith.addf %77, %73 : vector<8x16xf32>
    %cst_31 = arith.constant 1.250000e-01 : f32
    %79 = vector.broadcast %cst_31 : f32 to vector<8x16xf32>
    %80 = arith.mulf %79, %78 : vector<8x16xf32>
    %81 = arith.addf %7, %80 : vector<8x16xf32>
    %c1_32 = arith.constant 1 : index
    %c0_33 = arith.constant 0 : index
    %c0_34 = arith.constant 0 : index
    %c0_35 = arith.constant 0 : index
    %82 = vector.load %arg1[%c1_32, %c0_33, %c0_34, %c0_35] : memref<7x4x8x16xf32, #tpu.memory_space<vmem>>, vector<1x1x8x16xf32>
    %83 = vector.shape_cast %82 : vector<1x1x8x16xf32> to vector<8x16xf32>
    %c1_36 = arith.constant 1 : index
    %c1_37 = arith.constant 1 : index
    %c0_38 = arith.constant 0 : index
    %c0_39 = arith.constant 0 : index
    %84 = vector.load %arg1[%c1_36, %c1_37, %c0_38, %c0_39] : memref<7x4x8x16xf32, #tpu.memory_space<vmem>>, vector<1x1x8x16xf32>
    %85 = vector.shape_cast %84 : vector<1x1x8x16xf32> to vector<8x16xf32>
    %c1_40 = arith.constant 1 : index
    %c2_41 = arith.constant 2 : index
    %c0_42 = arith.constant 0 : index
    %c0_43 = arith.constant 0 : index
    %86 = vector.load %arg1[%c1_40, %c2_41, %c0_42, %c0_43] : memref<7x4x8x16xf32, #tpu.memory_space<vmem>>, vector<1x1x8x16xf32>
    %87 = vector.shape_cast %86 : vector<1x1x8x16xf32> to vector<8x16xf32>
    %c1_44 = arith.constant 1 : index
    %c3_45 = arith.constant 3 : index
    %c0_46 = arith.constant 0 : index
    %c0_47 = arith.constant 0 : index
    %88 = vector.load %arg1[%c1_44, %c3_45, %c0_46, %c0_47] : memref<7x4x8x16xf32, #tpu.memory_space<vmem>>, vector<1x1x8x16xf32>
    %89 = vector.shape_cast %88 : vector<1x1x8x16xf32> to vector<8x16xf32>
    %cst_48 = arith.constant -1.000000e+00 : f32
    %cst_49 = arith.constant 1.000000e+00 : f32
    %90 = vector.broadcast %cst_48 : f32 to vector<8x16xf32>
    %91 = arith.maximumf %90, %81 : vector<8x16xf32>
    %92 = vector.broadcast %cst_49 : f32 to vector<8x16xf32>
    %93 = arith.minimumf %92, %91 : vector<8x16xf32>
    %94 = arith.select %2, %93, %81 : vector<8x16xi1>, vector<8x16xf32>
    %cst_50 = arith.constant dense<0.000000e+00> : vector<8x16xf32>
    %95 = tpu.matmul %94, %3, %cst_50 {dimension_numbers = #tpu.dot_dimension_numbers<[1], [0], [0], [1], [0, 0, 1, 1], [], []>} : vector<8x16xf32>, vector<16x16xf32>, vector<8x16xf32> -> vector<8x16xf32>
    %96 = arith.addf %95, %6 : vector<8x16xf32>
    %97 = math.tanh %96 : vector<8x16xf32>
    %98 = vector.extract_strided_slice %83 {offsets = [0, 0], sizes = [8, 1], strides = [1, 1]} : vector<8x16xf32> to vector<8x1xf32>
    %99 = vector.broadcast %98 : vector<8x1xf32> to vector<8x16xf32>
    %100 = arith.mulf %97, %99 : vector<8x16xf32>
    %101 = arith.addf %83, %100 : vector<8x16xf32>
    %cst_51 = arith.constant 0.333333343 : f32
    %102 = vector.broadcast %cst_51 : f32 to vector<8x16xf32>
    %103 = arith.mulf %101, %102 : vector<8x16xf32>
    %104 = arith.addf %81, %103 : vector<8x16xf32>
    %cst_52 = arith.constant -1.000000e+00 : f32
    %cst_53 = arith.constant 1.000000e+00 : f32
    %105 = vector.broadcast %cst_52 : f32 to vector<8x16xf32>
    %106 = arith.maximumf %105, %104 : vector<8x16xf32>
    %107 = vector.broadcast %cst_53 : f32 to vector<8x16xf32>
    %108 = arith.minimumf %107, %106 : vector<8x16xf32>
    %109 = arith.select %2, %108, %104 : vector<8x16xi1>, vector<8x16xf32>
    %cst_54 = arith.constant dense<0.000000e+00> : vector<8x16xf32>
    %110 = tpu.matmul %109, %3, %cst_54 {dimension_numbers = #tpu.dot_dimension_numbers<[1], [0], [0], [1], [0, 0, 1, 1], [], []>} : vector<8x16xf32>, vector<16x16xf32>, vector<8x16xf32> -> vector<8x16xf32>
    %111 = arith.addf %110, %6 : vector<8x16xf32>
    %112 = math.tanh %111 : vector<8x16xf32>
    %113 = vector.extract_strided_slice %85 {offsets = [0, 0], sizes = [8, 1], strides = [1, 1]} : vector<8x16xf32> to vector<8x1xf32>
    %114 = vector.broadcast %113 : vector<8x1xf32> to vector<8x16xf32>
    %115 = arith.mulf %112, %114 : vector<8x16xf32>
    %116 = arith.addf %85, %115 : vector<8x16xf32>
    %cst_55 = arith.constant 0.333333343 : f32
    %117 = vector.broadcast %cst_55 : f32 to vector<8x16xf32>
    %118 = arith.mulf %101, %117 : vector<8x16xf32>
    %119 = arith.subf %116, %118 : vector<8x16xf32>
    %120 = arith.addf %81, %119 : vector<8x16xf32>
    %cst_56 = arith.constant -1.000000e+00 : f32
    %cst_57 = arith.constant 1.000000e+00 : f32
    %121 = vector.broadcast %cst_56 : f32 to vector<8x16xf32>
    %122 = arith.maximumf %121, %120 : vector<8x16xf32>
    %123 = vector.broadcast %cst_57 : f32 to vector<8x16xf32>
    %124 = arith.minimumf %123, %122 : vector<8x16xf32>
    %125 = arith.select %2, %124, %120 : vector<8x16xi1>, vector<8x16xf32>
    %cst_58 = arith.constant dense<0.000000e+00> : vector<8x16xf32>
    %126 = tpu.matmul %125, %3, %cst_58 {dimension_numbers = #tpu.dot_dimension_numbers<[1], [0], [0], [1], [0, 0, 1, 1], [], []>} : vector<8x16xf32>, vector<16x16xf32>, vector<8x16xf32> -> vector<8x16xf32>
    %127 = arith.addf %126, %6 : vector<8x16xf32>
    %128 = math.tanh %127 : vector<8x16xf32>
    %129 = vector.extract_strided_slice %87 {offsets = [0, 0], sizes = [8, 1], strides = [1, 1]} : vector<8x16xf32> to vector<8x1xf32>
    %130 = vector.broadcast %129 : vector<8x1xf32> to vector<8x16xf32>
    %131 = arith.mulf %128, %130 : vector<8x16xf32>
    %132 = arith.addf %87, %131 : vector<8x16xf32>
    %133 = arith.subf %101, %116 : vector<8x16xf32>
    %134 = arith.addf %133, %132 : vector<8x16xf32>
    %135 = arith.addf %81, %134 : vector<8x16xf32>
    %cst_59 = arith.constant -1.000000e+00 : f32
    %cst_60 = arith.constant 1.000000e+00 : f32
    %136 = vector.broadcast %cst_59 : f32 to vector<8x16xf32>
    %137 = arith.maximumf %136, %135 : vector<8x16xf32>
    %138 = vector.broadcast %cst_60 : f32 to vector<8x16xf32>
    %139 = arith.minimumf %138, %137 : vector<8x16xf32>
    %140 = arith.select %2, %139, %135 : vector<8x16xi1>, vector<8x16xf32>
    %cst_61 = arith.constant dense<0.000000e+00> : vector<8x16xf32>
    %141 = tpu.matmul %140, %3, %cst_61 {dimension_numbers = #tpu.dot_dimension_numbers<[1], [0], [0], [1], [0, 0, 1, 1], [], []>} : vector<8x16xf32>, vector<16x16xf32>, vector<8x16xf32> -> vector<8x16xf32>
    %142 = arith.addf %141, %6 : vector<8x16xf32>
    %143 = math.tanh %142 : vector<8x16xf32>
    %144 = vector.extract_strided_slice %89 {offsets = [0, 0], sizes = [8, 1], strides = [1, 1]} : vector<8x16xf32> to vector<8x1xf32>
    %145 = vector.broadcast %144 : vector<8x1xf32> to vector<8x16xf32>
    %146 = arith.mulf %143, %145 : vector<8x16xf32>
    %147 = arith.addf %89, %146 : vector<8x16xf32>
    %148 = arith.addf %116, %132 : vector<8x16xf32>
    %cst_62 = arith.constant 3.000000e+00 : f32
    %149 = vector.broadcast %cst_62 : f32 to vector<8x16xf32>
    %150 = arith.mulf %149, %148 : vector<8x16xf32>
    %151 = arith.addf %101, %150 : vector<8x16xf32>
    %152 = arith.addf %151, %147 : vector<8x16xf32>
    %cst_63 = arith.constant 1.250000e-01 : f32
    %153 = vector.broadcast %cst_63 : f32 to vector<8x16xf32>
    %154 = arith.mulf %153, %152 : vector<8x16xf32>
    %155 = arith.addf %81, %154 : vector<8x16xf32>
    %c2_64 = arith.constant 2 : index
    %c0_65 = arith.constant 0 : index
    %c0_66 = arith.constant 0 : index
    %c0_67 = arith.constant 0 : index
    %156 = vector.load %arg1[%c2_64, %c0_65, %c0_66, %c0_67] : memref<7x4x8x16xf32, #tpu.memory_space<vmem>>, vector<1x1x8x16xf32>
    %157 = vector.shape_cast %156 : vector<1x1x8x16xf32> to vector<8x16xf32>
    %c2_68 = arith.constant 2 : index
    %c1_69 = arith.constant 1 : index
    %c0_70 = arith.constant 0 : index
    %c0_71 = arith.constant 0 : index
    %158 = vector.load %arg1[%c2_68, %c1_69, %c0_70, %c0_71] : memref<7x4x8x16xf32, #tpu.memory_space<vmem>>, vector<1x1x8x16xf32>
    %159 = vector.shape_cast %158 : vector<1x1x8x16xf32> to vector<8x16xf32>
    %c2_72 = arith.constant 2 : index
    %c2_73 = arith.constant 2 : index
    %c0_74 = arith.constant 0 : index
    %c0_75 = arith.constant 0 : index
    %160 = vector.load %arg1[%c2_72, %c2_73, %c0_74, %c0_75] : memref<7x4x8x16xf32, #tpu.memory_space<vmem>>, vector<1x1x8x16xf32>
    %161 = vector.shape_cast %160 : vector<1x1x8x16xf32> to vector<8x16xf32>
    %c2_76 = arith.constant 2 : index
    %c3_77 = arith.constant 3 : index
    %c0_78 = arith.constant 0 : index
    %c0_79 = arith.constant 0 : index
    %162 = vector.load %arg1[%c2_76, %c3_77, %c0_78, %c0_79] : memref<7x4x8x16xf32, #tpu.memory_space<vmem>>, vector<1x1x8x16xf32>
    %163 = vector.shape_cast %162 : vector<1x1x8x16xf32> to vector<8x16xf32>
    %cst_80 = arith.constant -1.000000e+00 : f32
    %cst_81 = arith.constant 1.000000e+00 : f32
    %164 = vector.broadcast %cst_80 : f32 to vector<8x16xf32>
    %165 = arith.maximumf %164, %155 : vector<8x16xf32>
    %166 = vector.broadcast %cst_81 : f32 to vector<8x16xf32>
    %167 = arith.minimumf %166, %165 : vector<8x16xf32>
    %168 = arith.select %2, %167, %155 : vector<8x16xi1>, vector<8x16xf32>
    %cst_82 = arith.constant dense<0.000000e+00> : vector<8x16xf32>
    %169 = tpu.matmul %168, %3, %cst_82 {dimension_numbers = #tpu.dot_dimension_numbers<[1], [0], [0], [1], [0, 0, 1, 1], [], []>} : vector<8x16xf32>, vector<16x16xf32>, vector<8x16xf32> -> vector<8x16xf32>
    %170 = arith.addf %169, %6 : vector<8x16xf32>
    %171 = math.tanh %170 : vector<8x16xf32>
    %172 = vector.extract_strided_slice %157 {offsets = [0, 0], sizes = [8, 1], strides = [1, 1]} : vector<8x16xf32> to vector<8x1xf32>
    %173 = vector.broadcast %172 : vector<8x1xf32> to vector<8x16xf32>
    %174 = arith.mulf %171, %173 : vector<8x16xf32>
    %175 = arith.addf %157, %174 : vector<8x16xf32>
    %cst_83 = arith.constant 0.333333343 : f32
    %176 = vector.broadcast %cst_83 : f32 to vector<8x16xf32>
    %177 = arith.mulf %175, %176 : vector<8x16xf32>
    %178 = arith.addf %155, %177 : vector<8x16xf32>
    %cst_84 = arith.constant -1.000000e+00 : f32
    %cst_85 = arith.constant 1.000000e+00 : f32
    %179 = vector.broadcast %cst_84 : f32 to vector<8x16xf32>
    %180 = arith.maximumf %179, %178 : vector<8x16xf32>
    %181 = vector.broadcast %cst_85 : f32 to vector<8x16xf32>
    %182 = arith.minimumf %181, %180 : vector<8x16xf32>
    %183 = arith.select %2, %182, %178 : vector<8x16xi1>, vector<8x16xf32>
    %cst_86 = arith.constant dense<0.000000e+00> : vector<8x16xf32>
    %184 = tpu.matmul %183, %3, %cst_86 {dimension_numbers = #tpu.dot_dimension_numbers<[1], [0], [0], [1], [0, 0, 1, 1], [], []>} : vector<8x16xf32>, vector<16x16xf32>, vector<8x16xf32> -> vector<8x16xf32>
    %185 = arith.addf %184, %6 : vector<8x16xf32>
    %186 = math.tanh %185 : vector<8x16xf32>
    %187 = vector.extract_strided_slice %159 {offsets = [0, 0], sizes = [8, 1], strides = [1, 1]} : vector<8x16xf32> to vector<8x1xf32>
    %188 = vector.broadcast %187 : vector<8x1xf32> to vector<8x16xf32>
    %189 = arith.mulf %186, %188 : vector<8x16xf32>
    %190 = arith.addf %159, %189 : vector<8x16xf32>
    %cst_87 = arith.constant 0.333333343 : f32
    %191 = vector.broadcast %cst_87 : f32 to vector<8x16xf32>
    %192 = arith.mulf %175, %191 : vector<8x16xf32>
    %193 = arith.subf %190, %192 : vector<8x16xf32>
    %194 = arith.addf %155, %193 : vector<8x16xf32>
    %cst_88 = arith.constant -1.000000e+00 : f32
    %cst_89 = arith.constant 1.000000e+00 : f32
    %195 = vector.broadcast %cst_88 : f32 to vector<8x16xf32>
    %196 = arith.maximumf %195, %194 : vector<8x16xf32>
    %197 = vector.broadcast %cst_89 : f32 to vector<8x16xf32>
    %198 = arith.minimumf %197, %196 : vector<8x16xf32>
    %199 = arith.select %2, %198, %194 : vector<8x16xi1>, vector<8x16xf32>
    %cst_90 = arith.constant dense<0.000000e+00> : vector<8x16xf32>
    %200 = tpu.matmul %199, %3, %cst_90 {dimension_numbers = #tpu.dot_dimension_numbers<[1], [0], [0], [1], [0, 0, 1, 1], [], []>} : vector<8x16xf32>, vector<16x16xf32>, vector<8x16xf32> -> vector<8x16xf32>
    %201 = arith.addf %200, %6 : vector<8x16xf32>
    %202 = math.tanh %201 : vector<8x16xf32>
    %203 = vector.extract_strided_slice %161 {offsets = [0, 0], sizes = [8, 1], strides = [1, 1]} : vector<8x16xf32> to vector<8x1xf32>
    %204 = vector.broadcast %203 : vector<8x1xf32> to vector<8x16xf32>
    %205 = arith.mulf %202, %204 : vector<8x16xf32>
    %206 = arith.addf %161, %205 : vector<8x16xf32>
    %207 = arith.subf %175, %190 : vector<8x16xf32>
    %208 = arith.addf %207, %206 : vector<8x16xf32>
    %209 = arith.addf %155, %208 : vector<8x16xf32>
    %cst_91 = arith.constant -1.000000e+00 : f32
    %cst_92 = arith.constant 1.000000e+00 : f32
    %210 = vector.broadcast %cst_91 : f32 to vector<8x16xf32>
    %211 = arith.maximumf %210, %209 : vector<8x16xf32>
    %212 = vector.broadcast %cst_92 : f32 to vector<8x16xf32>
    %213 = arith.minimumf %212, %211 : vector<8x16xf32>
    %214 = arith.select %2, %213, %209 : vector<8x16xi1>, vector<8x16xf32>
    %cst_93 = arith.constant dense<0.000000e+00> : vector<8x16xf32>
    %215 = tpu.matmul %214, %3, %cst_93 {dimension_numbers = #tpu.dot_dimension_numbers<[1], [0], [0], [1], [0, 0, 1, 1], [], []>} : vector<8x16xf32>, vector<16x16xf32>, vector<8x16xf32> -> vector<8x16xf32>
    %216 = arith.addf %215, %6 : vector<8x16xf32>
    %217 = math.tanh %216 : vector<8x16xf32>
    %218 = vector.extract_strided_slice %163 {offsets = [0, 0], sizes = [8, 1], strides = [1, 1]} : vector<8x16xf32> to vector<8x1xf32>
    %219 = vector.broadcast %218 : vector<8x1xf32> to vector<8x16xf32>
    %220 = arith.mulf %217, %219 : vector<8x16xf32>
    %221 = arith.addf %163, %220 : vector<8x16xf32>
    %222 = arith.addf %190, %206 : vector<8x16xf32>
    %cst_94 = arith.constant 3.000000e+00 : f32
    %223 = vector.broadcast %cst_94 : f32 to vector<8x16xf32>
    %224 = arith.mulf %223, %222 : vector<8x16xf32>
    %225 = arith.addf %175, %224 : vector<8x16xf32>
    %226 = arith.addf %225, %221 : vector<8x16xf32>
    %cst_95 = arith.constant 1.250000e-01 : f32
    %227 = vector.broadcast %cst_95 : f32 to vector<8x16xf32>
    %228 = arith.mulf %227, %226 : vector<8x16xf32>
    %229 = arith.addf %155, %228 : vector<8x16xf32>
    %c3_96 = arith.constant 3 : index
    %c0_97 = arith.constant 0 : index
    %c0_98 = arith.constant 0 : index
    %c0_99 = arith.constant 0 : index
    %230 = vector.load %arg1[%c3_96, %c0_97, %c0_98, %c0_99] : memref<7x4x8x16xf32, #tpu.memory_space<vmem>>, vector<1x1x8x16xf32>
    %231 = vector.shape_cast %230 : vector<1x1x8x16xf32> to vector<8x16xf32>
    %c3_100 = arith.constant 3 : index
    %c1_101 = arith.constant 1 : index
    %c0_102 = arith.constant 0 : index
    %c0_103 = arith.constant 0 : index
    %232 = vector.load %arg1[%c3_100, %c1_101, %c0_102, %c0_103] : memref<7x4x8x16xf32, #tpu.memory_space<vmem>>, vector<1x1x8x16xf32>
    %233 = vector.shape_cast %232 : vector<1x1x8x16xf32> to vector<8x16xf32>
    %c3_104 = arith.constant 3 : index
    %c2_105 = arith.constant 2 : index
    %c0_106 = arith.constant 0 : index
    %c0_107 = arith.constant 0 : index
    %234 = vector.load %arg1[%c3_104, %c2_105, %c0_106, %c0_107] : memref<7x4x8x16xf32, #tpu.memory_space<vmem>>, vector<1x1x8x16xf32>
    %235 = vector.shape_cast %234 : vector<1x1x8x16xf32> to vector<8x16xf32>
    %c3_108 = arith.constant 3 : index
    %c3_109 = arith.constant 3 : index
    %c0_110 = arith.constant 0 : index
    %c0_111 = arith.constant 0 : index
    %236 = vector.load %arg1[%c3_108, %c3_109, %c0_110, %c0_111] : memref<7x4x8x16xf32, #tpu.memory_space<vmem>>, vector<1x1x8x16xf32>
    %237 = vector.shape_cast %236 : vector<1x1x8x16xf32> to vector<8x16xf32>
    %cst_112 = arith.constant -1.000000e+00 : f32
    %cst_113 = arith.constant 1.000000e+00 : f32
    %238 = vector.broadcast %cst_112 : f32 to vector<8x16xf32>
    %239 = arith.maximumf %238, %229 : vector<8x16xf32>
    %240 = vector.broadcast %cst_113 : f32 to vector<8x16xf32>
    %241 = arith.minimumf %240, %239 : vector<8x16xf32>
    %242 = arith.select %2, %241, %229 : vector<8x16xi1>, vector<8x16xf32>
    %cst_114 = arith.constant dense<0.000000e+00> : vector<8x16xf32>
    %243 = tpu.matmul %242, %3, %cst_114 {dimension_numbers = #tpu.dot_dimension_numbers<[1], [0], [0], [1], [0, 0, 1, 1], [], []>} : vector<8x16xf32>, vector<16x16xf32>, vector<8x16xf32> -> vector<8x16xf32>
    %244 = arith.addf %243, %6 : vector<8x16xf32>
    %245 = math.tanh %244 : vector<8x16xf32>
    %246 = vector.extract_strided_slice %231 {offsets = [0, 0], sizes = [8, 1], strides = [1, 1]} : vector<8x16xf32> to vector<8x1xf32>
    %247 = vector.broadcast %246 : vector<8x1xf32> to vector<8x16xf32>
    %248 = arith.mulf %245, %247 : vector<8x16xf32>
    %249 = arith.addf %231, %248 : vector<8x16xf32>
    %cst_115 = arith.constant 0.333333343 : f32
    %250 = vector.broadcast %cst_115 : f32 to vector<8x16xf32>
    %251 = arith.mulf %249, %250 : vector<8x16xf32>
    %252 = arith.addf %229, %251 : vector<8x16xf32>
    %cst_116 = arith.constant -1.000000e+00 : f32
    %cst_117 = arith.constant 1.000000e+00 : f32
    %253 = vector.broadcast %cst_116 : f32 to vector<8x16xf32>
    %254 = arith.maximumf %253, %252 : vector<8x16xf32>
    %255 = vector.broadcast %cst_117 : f32 to vector<8x16xf32>
    %256 = arith.minimumf %255, %254 : vector<8x16xf32>
    %257 = arith.select %2, %256, %252 : vector<8x16xi1>, vector<8x16xf32>
    %cst_118 = arith.constant dense<0.000000e+00> : vector<8x16xf32>
    %258 = tpu.matmul %257, %3, %cst_118 {dimension_numbers = #tpu.dot_dimension_numbers<[1], [0], [0], [1], [0, 0, 1, 1], [], []>} : vector<8x16xf32>, vector<16x16xf32>, vector<8x16xf32> -> vector<8x16xf32>
    %259 = arith.addf %258, %6 : vector<8x16xf32>
    %260 = math.tanh %259 : vector<8x16xf32>
    %261 = vector.extract_strided_slice %233 {offsets = [0, 0], sizes = [8, 1], strides = [1, 1]} : vector<8x16xf32> to vector<8x1xf32>
    %262 = vector.broadcast %261 : vector<8x1xf32> to vector<8x16xf32>
    %263 = arith.mulf %260, %262 : vector<8x16xf32>
    %264 = arith.addf %233, %263 : vector<8x16xf32>
    %cst_119 = arith.constant 0.333333343 : f32
    %265 = vector.broadcast %cst_119 : f32 to vector<8x16xf32>
    %266 = arith.mulf %249, %265 : vector<8x16xf32>
    %267 = arith.subf %264, %266 : vector<8x16xf32>
    %268 = arith.addf %229, %267 : vector<8x16xf32>
    %cst_120 = arith.constant -1.000000e+00 : f32
    %cst_121 = arith.constant 1.000000e+00 : f32
    %269 = vector.broadcast %cst_120 : f32 to vector<8x16xf32>
    %270 = arith.maximumf %269, %268 : vector<8x16xf32>
    %271 = vector.broadcast %cst_121 : f32 to vector<8x16xf32>
    %272 = arith.minimumf %271, %270 : vector<8x16xf32>
    %273 = arith.select %2, %272, %268 : vector<8x16xi1>, vector<8x16xf32>
    %cst_122 = arith.constant dense<0.000000e+00> : vector<8x16xf32>
    %274 = tpu.matmul %273, %3, %cst_122 {dimension_numbers = #tpu.dot_dimension_numbers<[1], [0], [0], [1], [0, 0, 1, 1], [], []>} : vector<8x16xf32>, vector<16x16xf32>, vector<8x16xf32> -> vector<8x16xf32>
    %275 = arith.addf %274, %6 : vector<8x16xf32>
    %276 = math.tanh %275 : vector<8x16xf32>
    %277 = vector.extract_strided_slice %235 {offsets = [0, 0], sizes = [8, 1], strides = [1, 1]} : vector<8x16xf32> to vector<8x1xf32>
    %278 = vector.broadcast %277 : vector<8x1xf32> to vector<8x16xf32>
    %279 = arith.mulf %276, %278 : vector<8x16xf32>
    %280 = arith.addf %235, %279 : vector<8x16xf32>
    %281 = arith.subf %249, %264 : vector<8x16xf32>
    %282 = arith.addf %281, %280 : vector<8x16xf32>
    %283 = arith.addf %229, %282 : vector<8x16xf32>
    %cst_123 = arith.constant -1.000000e+00 : f32
    %cst_124 = arith.constant 1.000000e+00 : f32
    %284 = vector.broadcast %cst_123 : f32 to vector<8x16xf32>
    %285 = arith.maximumf %284, %283 : vector<8x16xf32>
    %286 = vector.broadcast %cst_124 : f32 to vector<8x16xf32>
    %287 = arith.minimumf %286, %285 : vector<8x16xf32>
    %288 = arith.select %2, %287, %283 : vector<8x16xi1>, vector<8x16xf32>
    %cst_125 = arith.constant dense<0.000000e+00> : vector<8x16xf32>
    %289 = tpu.matmul %288, %3, %cst_125 {dimension_numbers = #tpu.dot_dimension_numbers<[1], [0], [0], [1], [0, 0, 1, 1], [], []>} : vector<8x16xf32>, vector<16x16xf32>, vector<8x16xf32> -> vector<8x16xf32>
    %290 = arith.addf %289, %6 : vector<8x16xf32>
    %291 = math.tanh %290 : vector<8x16xf32>
    %292 = vector.extract_strided_slice %237 {offsets = [0, 0], sizes = [8, 1], strides = [1, 1]} : vector<8x16xf32> to vector<8x1xf32>
    %293 = vector.broadcast %292 : vector<8x1xf32> to vector<8x16xf32>
    %294 = arith.mulf %291, %293 : vector<8x16xf32>
    %295 = arith.addf %237, %294 : vector<8x16xf32>
    %296 = arith.addf %264, %280 : vector<8x16xf32>
    %cst_126 = arith.constant 3.000000e+00 : f32
    %297 = vector.broadcast %cst_126 : f32 to vector<8x16xf32>
    %298 = arith.mulf %297, %296 : vector<8x16xf32>
    %299 = arith.addf %249, %298 : vector<8x16xf32>
    %300 = arith.addf %299, %295 : vector<8x16xf32>
    %cst_127 = arith.constant 1.250000e-01 : f32
    %301 = vector.broadcast %cst_127 : f32 to vector<8x16xf32>
    %302 = arith.mulf %301, %300 : vector<8x16xf32>
    %303 = arith.addf %229, %302 : vector<8x16xf32>
    %c0_128 = arith.constant 0 : index
    %c0_129 = arith.constant 0 : index
    %c0_130 = arith.constant 0 : index
    %304 = vector.load %arg7[%c0_128, %c0_129, %c0_130] : memref<4x8x16xf32, #tpu.memory_space<vmem>>, vector<1x8x16xf32>
    %305 = vector.shape_cast %304 : vector<1x8x16xf32> to vector<8x16xf32>
    %306 = vector.shape_cast %303 : vector<8x16xf32> to vector<1x8x16xf32>
    tpu.vector_store %arg7[%c0_128, %c0_129, %c0_130], %306 {strides = array<i32>} : memref<4x8x16xf32, #tpu.memory_space<vmem>>, vector<1x8x16xf32>,
    %c4 = arith.constant 4 : index
    %c0_131 = arith.constant 0 : index
    %c0_132 = arith.constant 0 : index
    %c0_133 = arith.constant 0 : index
    %307 = vector.load %arg1[%c4, %c0_131, %c0_132, %c0_133] : memref<7x4x8x16xf32, #tpu.memory_space<vmem>>, vector<1x1x8x16xf32>
    %308 = vector.shape_cast %307 : vector<1x1x8x16xf32> to vector<8x16xf32>
    %c4_134 = arith.constant 4 : index
    %c1_135 = arith.constant 1 : index
    %c0_136 = arith.constant 0 : index
    %c0_137 = arith.constant 0 : index
    %309 = vector.load %arg1[%c4_134, %c1_135, %c0_136, %c0_137] : memref<7x4x8x16xf32, #tpu.memory_space<vmem>>, vector<1x1x8x16xf32>
    %310 = vector.shape_cast %309 : vector<1x1x8x16xf32> to vector<8x16xf32>
    %c4_138 = arith.constant 4 : index
    %c2_139 = arith.constant 2 : index
    %c0_140 = arith.constant 0 : index
    %c0_141 = arith.constant 0 : index
    %311 = vector.load %arg1[%c4_138, %c2_139, %c0_140, %c0_141] : memref<7x4x8x16xf32, #tpu.memory_space<vmem>>, vector<1x1x8x16xf32>
    %312 = vector.shape_cast %311 : vector<1x1x8x16xf32> to vector<8x16xf32>
    %c4_142 = arith.constant 4 : index
    %c3_143 = arith.constant 3 : index
    %c0_144 = arith.constant 0 : index
    %c0_145 = arith.constant 0 : index
    %313 = vector.load %arg1[%c4_142, %c3_143, %c0_144, %c0_145] : memref<7x4x8x16xf32, #tpu.memory_space<vmem>>, vector<1x1x8x16xf32>
    %314 = vector.shape_cast %313 : vector<1x1x8x16xf32> to vector<8x16xf32>
    %cst_146 = arith.constant -1.000000e+00 : f32
    %cst_147 = arith.constant 1.000000e+00 : f32
    %315 = vector.broadcast %cst_146 : f32 to vector<8x16xf32>
    %316 = arith.maximumf %315, %303 : vector<8x16xf32>
    %317 = vector.broadcast %cst_147 : f32 to vector<8x16xf32>
    %318 = arith.minimumf %317, %316 : vector<8x16xf32>
    %319 = arith.select %2, %318, %303 : vector<8x16xi1>, vector<8x16xf32>
    %cst_148 = arith.constant dense<0.000000e+00> : vector<8x16xf32>
    %320 = tpu.matmul %319, %3, %cst_148 {dimension_numbers = #tpu.dot_dimension_numbers<[1], [0], [0], [1], [0, 0, 1, 1], [], []>} : vector<8x16xf32>, vector<16x16xf32>, vector<8x16xf32> -> vector<8x16xf32>
    %321 = arith.addf %320, %6 : vector<8x16xf32>
    %322 = math.tanh %321 : vector<8x16xf32>
    %323 = vector.extract_strided_slice %308 {offsets = [0, 0], sizes = [8, 1], strides = [1, 1]} : vector<8x16xf32> to vector<8x1xf32>
    %324 = vector.broadcast %323 : vector<8x1xf32> to vector<8x16xf32>
    %325 = arith.mulf %322, %324 : vector<8x16xf32>
    %326 = arith.addf %308, %325 : vector<8x16xf32>
    %cst_149 = arith.constant 0.333333343 : f32
    %327 = vector.broadcast %cst_149 : f32 to vector<8x16xf32>
    %328 = arith.mulf %326, %327 : vector<8x16xf32>
    %329 = arith.addf %303, %328 : vector<8x16xf32>
    %cst_150 = arith.constant -1.000000e+00 : f32
    %cst_151 = arith.constant 1.000000e+00 : f32
    %330 = vector.broadcast %cst_150 : f32 to vector<8x16xf32>
    %331 = arith.maximumf %330, %329 : vector<8x16xf32>
    %332 = vector.broadcast %cst_151 : f32 to vector<8x16xf32>
    %333 = arith.minimumf %332, %331 : vector<8x16xf32>
    %334 = arith.select %2, %333, %329 : vector<8x16xi1>, vector<8x16xf32>
    %cst_152 = arith.constant dense<0.000000e+00> : vector<8x16xf32>
    %335 = tpu.matmul %334, %3, %cst_152 {dimension_numbers = #tpu.dot_dimension_numbers<[1], [0], [0], [1], [0, 0, 1, 1], [], []>} : vector<8x16xf32>, vector<16x16xf32>, vector<8x16xf32> -> vector<8x16xf32>
    %336 = arith.addf %335, %6 : vector<8x16xf32>
    %337 = math.tanh %336 : vector<8x16xf32>
    %338 = vector.extract_strided_slice %310 {offsets = [0, 0], sizes = [8, 1], strides = [1, 1]} : vector<8x16xf32> to vector<8x1xf32>
    %339 = vector.broadcast %338 : vector<8x1xf32> to vector<8x16xf32>
    %340 = arith.mulf %337, %339 : vector<8x16xf32>
    %341 = arith.addf %310, %340 : vector<8x16xf32>
    %cst_153 = arith.constant 0.333333343 : f32
    %342 = vector.broadcast %cst_153 : f32 to vector<8x16xf32>
    %343 = arith.mulf %326, %342 : vector<8x16xf32>
    %344 = arith.subf %341, %343 : vector<8x16xf32>
    %345 = arith.addf %303, %344 : vector<8x16xf32>
    %cst_154 = arith.constant -1.000000e+00 : f32
    %cst_155 = arith.constant 1.000000e+00 : f32
    %346 = vector.broadcast %cst_154 : f32 to vector<8x16xf32>
    %347 = arith.maximumf %346, %345 : vector<8x16xf32>
    %348 = vector.broadcast %cst_155 : f32 to vector<8x16xf32>
    %349 = arith.minimumf %348, %347 : vector<8x16xf32>
    %350 = arith.select %2, %349, %345 : vector<8x16xi1>, vector<8x16xf32>
    %cst_156 = arith.constant dense<0.000000e+00> : vector<8x16xf32>
    %351 = tpu.matmul %350, %3, %cst_156 {dimension_numbers = #tpu.dot_dimension_numbers<[1], [0], [0], [1], [0, 0, 1, 1], [], []>} : vector<8x16xf32>, vector<16x16xf32>, vector<8x16xf32> -> vector<8x16xf32>
    %352 = arith.addf %351, %6 : vector<8x16xf32>
    %353 = math.tanh %352 : vector<8x16xf32>
    %354 = vector.extract_strided_slice %312 {offsets = [0, 0], sizes = [8, 1], strides = [1, 1]} : vector<8x16xf32> to vector<8x1xf32>
    %355 = vector.broadcast %354 : vector<8x1xf32> to vector<8x16xf32>
    %356 = arith.mulf %353, %355 : vector<8x16xf32>
    %357 = arith.addf %312, %356 : vector<8x16xf32>
    %358 = arith.subf %326, %341 : vector<8x16xf32>
    %359 = arith.addf %358, %357 : vector<8x16xf32>
    %360 = arith.addf %303, %359 : vector<8x16xf32>
    %cst_157 = arith.constant -1.000000e+00 : f32
    %cst_158 = arith.constant 1.000000e+00 : f32
    %361 = vector.broadcast %cst_157 : f32 to vector<8x16xf32>
    %362 = arith.maximumf %361, %360 : vector<8x16xf32>
    %363 = vector.broadcast %cst_158 : f32 to vector<8x16xf32>
    %364 = arith.minimumf %363, %362 : vector<8x16xf32>
    %365 = arith.select %2, %364, %360 : vector<8x16xi1>, vector<8x16xf32>
    %cst_159 = arith.constant dense<0.000000e+00> : vector<8x16xf32>
    %366 = tpu.matmul %365, %3, %cst_159 {dimension_numbers = #tpu.dot_dimension_numbers<[1], [0], [0], [1], [0, 0, 1, 1], [], []>} : vector<8x16xf32>, vector<16x16xf32>, vector<8x16xf32> -> vector<8x16xf32>
    %367 = arith.addf %366, %6 : vector<8x16xf32>
    %368 = math.tanh %367 : vector<8x16xf32>
    %369 = vector.extract_strided_slice %314 {offsets = [0, 0], sizes = [8, 1], strides = [1, 1]} : vector<8x16xf32> to vector<8x1xf32>
    %370 = vector.broadcast %369 : vector<8x1xf32> to vector<8x16xf32>
    %371 = arith.mulf %368, %370 : vector<8x16xf32>
    %372 = arith.addf %314, %371 : vector<8x16xf32>
    %373 = arith.addf %341, %357 : vector<8x16xf32>
    %cst_160 = arith.constant 3.000000e+00 : f32
    %374 = vector.broadcast %cst_160 : f32 to vector<8x16xf32>
    %375 = arith.mulf %374, %373 : vector<8x16xf32>
    %376 = arith.addf %326, %375 : vector<8x16xf32>
    %377 = arith.addf %376, %372 : vector<8x16xf32>
    %cst_161 = arith.constant 1.250000e-01 : f32
    %378 = vector.broadcast %cst_161 : f32 to vector<8x16xf32>
    %379 = arith.mulf %378, %377 : vector<8x16xf32>
    %380 = arith.addf %303, %379 : vector<8x16xf32>
    %c1_162 = arith.constant 1 : index
    %c0_163 = arith.constant 0 : index
    %c0_164 = arith.constant 0 : index
    %381 = vector.load %arg7[%c1_162, %c0_163, %c0_164] : memref<4x8x16xf32, #tpu.memory_space<vmem>>, vector<1x8x16xf32>
    %382 = vector.shape_cast %381 : vector<1x8x16xf32> to vector<8x16xf32>
    %383 = vector.shape_cast %380 : vector<8x16xf32> to vector<1x8x16xf32>
    tpu.vector_store %arg7[%c1_162, %c0_163, %c0_164], %383 {strides = array<i32>} : memref<4x8x16xf32, #tpu.memory_space<vmem>>, vector<1x8x16xf32>,
    %c5 = arith.constant 5 : index
    %c0_165 = arith.constant 0 : index
    %c0_166 = arith.constant 0 : index
    %c0_167 = arith.constant 0 : index
    %384 = vector.load %arg1[%c5, %c0_165, %c0_166, %c0_167] : memref<7x4x8x16xf32, #tpu.memory_space<vmem>>, vector<1x1x8x16xf32>
    %385 = vector.shape_cast %384 : vector<1x1x8x16xf32> to vector<8x16xf32>
    %c5_168 = arith.constant 5 : index
    %c1_169 = arith.constant 1 : index
    %c0_170 = arith.constant 0 : index
    %c0_171 = arith.constant 0 : index
    %386 = vector.load %arg1[%c5_168, %c1_169, %c0_170, %c0_171] : memref<7x4x8x16xf32, #tpu.memory_space<vmem>>, vector<1x1x8x16xf32>
    %387 = vector.shape_cast %386 : vector<1x1x8x16xf32> to vector<8x16xf32>
    %c5_172 = arith.constant 5 : index
    %c2_173 = arith.constant 2 : index
    %c0_174 = arith.constant 0 : index
    %c0_175 = arith.constant 0 : index
    %388 = vector.load %arg1[%c5_172, %c2_173, %c0_174, %c0_175] : memref<7x4x8x16xf32, #tpu.memory_space<vmem>>, vector<1x1x8x16xf32>
    %389 = vector.shape_cast %388 : vector<1x1x8x16xf32> to vector<8x16xf32>
    %c5_176 = arith.constant 5 : index
    %c3_177 = arith.constant 3 : index
    %c0_178 = arith.constant 0 : index
    %c0_179 = arith.constant 0 : index
    %390 = vector.load %arg1[%c5_176, %c3_177, %c0_178, %c0_179] : memref<7x4x8x16xf32, #tpu.memory_space<vmem>>, vector<1x1x8x16xf32>
    %391 = vector.shape_cast %390 : vector<1x1x8x16xf32> to vector<8x16xf32>
    %cst_180 = arith.constant -1.000000e+00 : f32
    %cst_181 = arith.constant 1.000000e+00 : f32
    %392 = vector.broadcast %cst_180 : f32 to vector<8x16xf32>
    %393 = arith.maximumf %392, %380 : vector<8x16xf32>
    %394 = vector.broadcast %cst_181 : f32 to vector<8x16xf32>
    %395 = arith.minimumf %394, %393 : vector<8x16xf32>
    %396 = arith.select %2, %395, %380 : vector<8x16xi1>, vector<8x16xf32>
    %cst_182 = arith.constant dense<0.000000e+00> : vector<8x16xf32>
    %397 = tpu.matmul %396, %3, %cst_182 {dimension_numbers = #tpu.dot_dimension_numbers<[1], [0], [0], [1], [0, 0, 1, 1], [], []>} : vector<8x16xf32>, vector<16x16xf32>, vector<8x16xf32> -> vector<8x16xf32>
    %398 = arith.addf %397, %6 : vector<8x16xf32>
    %399 = math.tanh %398 : vector<8x16xf32>
    %400 = vector.extract_strided_slice %385 {offsets = [0, 0], sizes = [8, 1], strides = [1, 1]} : vector<8x16xf32> to vector<8x1xf32>
    %401 = vector.broadcast %400 : vector<8x1xf32> to vector<8x16xf32>
    %402 = arith.mulf %399, %401 : vector<8x16xf32>
    %403 = arith.addf %385, %402 : vector<8x16xf32>
    %cst_183 = arith.constant 0.333333343 : f32
    %404 = vector.broadcast %cst_183 : f32 to vector<8x16xf32>
    %405 = arith.mulf %403, %404 : vector<8x16xf32>
    %406 = arith.addf %380, %405 : vector<8x16xf32>
    %cst_184 = arith.constant -1.000000e+00 : f32
    %cst_185 = arith.constant 1.000000e+00 : f32
    %407 = vector.broadcast %cst_184 : f32 to vector<8x16xf32>
    %408 = arith.maximumf %407, %406 : vector<8x16xf32>
    %409 = vector.broadcast %cst_185 : f32 to vector<8x16xf32>
    %410 = arith.minimumf %409, %408 : vector<8x16xf32>
    %411 = arith.select %2, %410, %406 : vector<8x16xi1>, vector<8x16xf32>
    %cst_186 = arith.constant dense<0.000000e+00> : vector<8x16xf32>
    %412 = tpu.matmul %411, %3, %cst_186 {dimension_numbers = #tpu.dot_dimension_numbers<[1], [0], [0], [1], [0, 0, 1, 1], [], []>} : vector<8x16xf32>, vector<16x16xf32>, vector<8x16xf32> -> vector<8x16xf32>
    %413 = arith.addf %412, %6 : vector<8x16xf32>
    %414 = math.tanh %413 : vector<8x16xf32>
    %415 = vector.extract_strided_slice %387 {offsets = [0, 0], sizes = [8, 1], strides = [1, 1]} : vector<8x16xf32> to vector<8x1xf32>
    %416 = vector.broadcast %415 : vector<8x1xf32> to vector<8x16xf32>
    %417 = arith.mulf %414, %416 : vector<8x16xf32>
    %418 = arith.addf %387, %417 : vector<8x16xf32>
    %cst_187 = arith.constant 0.333333343 : f32
    %419 = vector.broadcast %cst_187 : f32 to vector<8x16xf32>
    %420 = arith.mulf %403, %419 : vector<8x16xf32>
    %421 = arith.subf %418, %420 : vector<8x16xf32>
    %422 = arith.addf %380, %421 : vector<8x16xf32>
    %cst_188 = arith.constant -1.000000e+00 : f32
    %cst_189 = arith.constant 1.000000e+00 : f32
    %423 = vector.broadcast %cst_188 : f32 to vector<8x16xf32>
    %424 = arith.maximumf %423, %422 : vector<8x16xf32>
    %425 = vector.broadcast %cst_189 : f32 to vector<8x16xf32>
    %426 = arith.minimumf %425, %424 : vector<8x16xf32>
    %427 = arith.select %2, %426, %422 : vector<8x16xi1>, vector<8x16xf32>
    %cst_190 = arith.constant dense<0.000000e+00> : vector<8x16xf32>
    %428 = tpu.matmul %427, %3, %cst_190 {dimension_numbers = #tpu.dot_dimension_numbers<[1], [0], [0], [1], [0, 0, 1, 1], [], []>} : vector<8x16xf32>, vector<16x16xf32>, vector<8x16xf32> -> vector<8x16xf32>
    %429 = arith.addf %428, %6 : vector<8x16xf32>
    %430 = math.tanh %429 : vector<8x16xf32>
    %431 = vector.extract_strided_slice %389 {offsets = [0, 0], sizes = [8, 1], strides = [1, 1]} : vector<8x16xf32> to vector<8x1xf32>
    %432 = vector.broadcast %431 : vector<8x1xf32> to vector<8x16xf32>
    %433 = arith.mulf %430, %432 : vector<8x16xf32>
    %434 = arith.addf %389, %433 : vector<8x16xf32>
    %435 = arith.subf %403, %418 : vector<8x16xf32>
    %436 = arith.addf %435, %434 : vector<8x16xf32>
    %437 = arith.addf %380, %436 : vector<8x16xf32>
    %cst_191 = arith.constant -1.000000e+00 : f32
    %cst_192 = arith.constant 1.000000e+00 : f32
    %438 = vector.broadcast %cst_191 : f32 to vector<8x16xf32>
    %439 = arith.maximumf %438, %437 : vector<8x16xf32>
    %440 = vector.broadcast %cst_192 : f32 to vector<8x16xf32>
    %441 = arith.minimumf %440, %439 : vector<8x16xf32>
    %442 = arith.select %2, %441, %437 : vector<8x16xi1>, vector<8x16xf32>
    %cst_193 = arith.constant dense<0.000000e+00> : vector<8x16xf32>
    %443 = tpu.matmul %442, %3, %cst_193 {dimension_numbers = #tpu.dot_dimension_numbers<[1], [0], [0], [1], [0, 0, 1, 1], [], []>} : vector<8x16xf32>, vector<16x16xf32>, vector<8x16xf32> -> vector<8x16xf32>
    %444 = arith.addf %443, %6 : vector<8x16xf32>
    %445 = math.tanh %444 : vector<8x16xf32>
    %446 = vector.extract_strided_slice %391 {offsets = [0, 0], sizes = [8, 1], strides = [1, 1]} : vector<8x16xf32> to vector<8x1xf32>
    %447 = vector.broadcast %446 : vector<8x1xf32> to vector<8x16xf32>
    %448 = arith.mulf %445, %447 : vector<8x16xf32>
    %449 = arith.addf %391, %448 : vector<8x16xf32>
    %450 = arith.addf %418, %434 : vector<8x16xf32>
    %cst_194 = arith.constant 3.000000e+00 : f32
    %451 = vector.broadcast %cst_194 : f32 to vector<8x16xf32>
    %452 = arith.mulf %451, %450 : vector<8x16xf32>
    %453 = arith.addf %403, %452 : vector<8x16xf32>
    %454 = arith.addf %453, %449 : vector<8x16xf32>
    %cst_195 = arith.constant 1.250000e-01 : f32
    %455 = vector.broadcast %cst_195 : f32 to vector<8x16xf32>
    %456 = arith.mulf %455, %454 : vector<8x16xf32>
    %457 = arith.addf %380, %456 : vector<8x16xf32>
    %c2_196 = arith.constant 2 : index
    %c0_197 = arith.constant 0 : index
    %c0_198 = arith.constant 0 : index
    %458 = vector.load %arg7[%c2_196, %c0_197, %c0_198] : memref<4x8x16xf32, #tpu.memory_space<vmem>>, vector<1x8x16xf32>
    %459 = vector.shape_cast %458 : vector<1x8x16xf32> to vector<8x16xf32>
    %460 = vector.shape_cast %457 : vector<8x16xf32> to vector<1x8x16xf32>
    tpu.vector_store %arg7[%c2_196, %c0_197, %c0_198], %460 {strides = array<i32>} : memref<4x8x16xf32, #tpu.memory_space<vmem>>, vector<1x8x16xf32>,
    %c6 = arith.constant 6 : index
    %c0_199 = arith.constant 0 : index
    %c0_200 = arith.constant 0 : index
    %c0_201 = arith.constant 0 : index
    %461 = vector.load %arg1[%c6, %c0_199, %c0_200, %c0_201] : memref<7x4x8x16xf32, #tpu.memory_space<vmem>>, vector<1x1x8x16xf32>
    %462 = vector.shape_cast %461 : vector<1x1x8x16xf32> to vector<8x16xf32>
    %c6_202 = arith.constant 6 : index
    %c1_203 = arith.constant 1 : index
    %c0_204 = arith.constant 0 : index
    %c0_205 = arith.constant 0 : index
    %463 = vector.load %arg1[%c6_202, %c1_203, %c0_204, %c0_205] : memref<7x4x8x16xf32, #tpu.memory_space<vmem>>, vector<1x1x8x16xf32>
    %464 = vector.shape_cast %463 : vector<1x1x8x16xf32> to vector<8x16xf32>
    %c6_206 = arith.constant 6 : index
    %c2_207 = arith.constant 2 : index
    %c0_208 = arith.constant 0 : index
    %c0_209 = arith.constant 0 : index
    %465 = vector.load %arg1[%c6_206, %c2_207, %c0_208, %c0_209] : memref<7x4x8x16xf32, #tpu.memory_space<vmem>>, vector<1x1x8x16xf32>
    %466 = vector.shape_cast %465 : vector<1x1x8x16xf32> to vector<8x16xf32>
    %c6_210 = arith.constant 6 : index
    %c3_211 = arith.constant 3 : index
    %c0_212 = arith.constant 0 : index
    %c0_213 = arith.constant 0 : index
    %467 = vector.load %arg1[%c6_210, %c3_211, %c0_212, %c0_213] : memref<7x4x8x16xf32, #tpu.memory_space<vmem>>, vector<1x1x8x16xf32>
    %468 = vector.shape_cast %467 : vector<1x1x8x16xf32> to vector<8x16xf32>
    %cst_214 = arith.constant -1.000000e+00 : f32
    %cst_215 = arith.constant 1.000000e+00 : f32
    %469 = vector.broadcast %cst_214 : f32 to vector<8x16xf32>
    %470 = arith.maximumf %469, %457 : vector<8x16xf32>
    %471 = vector.broadcast %cst_215 : f32 to vector<8x16xf32>
    %472 = arith.minimumf %471, %470 : vector<8x16xf32>
    %473 = arith.select %2, %472, %457 : vector<8x16xi1>, vector<8x16xf32>
    %cst_216 = arith.constant dense<0.000000e+00> : vector<8x16xf32>
    %474 = tpu.matmul %473, %3, %cst_216 {dimension_numbers = #tpu.dot_dimension_numbers<[1], [0], [0], [1], [0, 0, 1, 1], [], []>} : vector<8x16xf32>, vector<16x16xf32>, vector<8x16xf32> -> vector<8x16xf32>
    %475 = arith.addf %474, %6 : vector<8x16xf32>
    %476 = math.tanh %475 : vector<8x16xf32>
    %477 = vector.extract_strided_slice %462 {offsets = [0, 0], sizes = [8, 1], strides = [1, 1]} : vector<8x16xf32> to vector<8x1xf32>
    %478 = vector.broadcast %477 : vector<8x1xf32> to vector<8x16xf32>
    %479 = arith.mulf %476, %478 : vector<8x16xf32>
    %480 = arith.addf %462, %479 : vector<8x16xf32>
    %cst_217 = arith.constant 0.333333343 : f32
    %481 = vector.broadcast %cst_217 : f32 to vector<8x16xf32>
    %482 = arith.mulf %480, %481 : vector<8x16xf32>
    %483 = arith.addf %457, %482 : vector<8x16xf32>
    %cst_218 = arith.constant -1.000000e+00 : f32
    %cst_219 = arith.constant 1.000000e+00 : f32
    %484 = vector.broadcast %cst_218 : f32 to vector<8x16xf32>
    %485 = arith.maximumf %484, %483 : vector<8x16xf32>
    %486 = vector.broadcast %cst_219 : f32 to vector<8x16xf32>
    %487 = arith.minimumf %486, %485 : vector<8x16xf32>
    %488 = arith.select %2, %487, %483 : vector<8x16xi1>, vector<8x16xf32>
    %cst_220 = arith.constant dense<0.000000e+00> : vector<8x16xf32>
    %489 = tpu.matmul %488, %3, %cst_220 {dimension_numbers = #tpu.dot_dimension_numbers<[1], [0], [0], [1], [0, 0, 1, 1], [], []>} : vector<8x16xf32>, vector<16x16xf32>, vector<8x16xf32> -> vector<8x16xf32>
    %490 = arith.addf %489, %6 : vector<8x16xf32>
    %491 = math.tanh %490 : vector<8x16xf32>
    %492 = vector.extract_strided_slice %464 {offsets = [0, 0], sizes = [8, 1], strides = [1, 1]} : vector<8x16xf32> to vector<8x1xf32>
    %493 = vector.broadcast %492 : vector<8x1xf32> to vector<8x16xf32>
    %494 = arith.mulf %491, %493 : vector<8x16xf32>
    %495 = arith.addf %464, %494 : vector<8x16xf32>
    %cst_221 = arith.constant 0.333333343 : f32
    %496 = vector.broadcast %cst_221 : f32 to vector<8x16xf32>
    %497 = arith.mulf %480, %496 : vector<8x16xf32>
    %498 = arith.subf %495, %497 : vector<8x16xf32>
    %499 = arith.addf %457, %498 : vector<8x16xf32>
    %cst_222 = arith.constant -1.000000e+00 : f32
    %cst_223 = arith.constant 1.000000e+00 : f32
    %500 = vector.broadcast %cst_222 : f32 to vector<8x16xf32>
    %501 = arith.maximumf %500, %499 : vector<8x16xf32>
    %502 = vector.broadcast %cst_223 : f32 to vector<8x16xf32>
    %503 = arith.minimumf %502, %501 : vector<8x16xf32>
    %504 = arith.select %2, %503, %499 : vector<8x16xi1>, vector<8x16xf32>
    %cst_224 = arith.constant dense<0.000000e+00> : vector<8x16xf32>
    %505 = tpu.matmul %504, %3, %cst_224 {dimension_numbers = #tpu.dot_dimension_numbers<[1], [0], [0], [1], [0, 0, 1, 1], [], []>} : vector<8x16xf32>, vector<16x16xf32>, vector<8x16xf32> -> vector<8x16xf32>
    %506 = arith.addf %505, %6 : vector<8x16xf32>
    %507 = math.tanh %506 : vector<8x16xf32>
    %508 = vector.extract_strided_slice %466 {offsets = [0, 0], sizes = [8, 1], strides = [1, 1]} : vector<8x16xf32> to vector<8x1xf32>
    %509 = vector.broadcast %508 : vector<8x1xf32> to vector<8x16xf32>
    %510 = arith.mulf %507, %509 : vector<8x16xf32>
    %511 = arith.addf %466, %510 : vector<8x16xf32>
    %512 = arith.subf %480, %495 : vector<8x16xf32>
    %513 = arith.addf %512, %511 : vector<8x16xf32>
    %514 = arith.addf %457, %513 : vector<8x16xf32>
    %cst_225 = arith.constant -1.000000e+00 : f32
    %cst_226 = arith.constant 1.000000e+00 : f32
    %515 = vector.broadcast %cst_225 : f32 to vector<8x16xf32>
    %516 = arith.maximumf %515, %514 : vector<8x16xf32>
    %517 = vector.broadcast %cst_226 : f32 to vector<8x16xf32>
    %518 = arith.minimumf %517, %516 : vector<8x16xf32>
    %519 = arith.select %2, %518, %514 : vector<8x16xi1>, vector<8x16xf32>
    %cst_227 = arith.constant dense<0.000000e+00> : vector<8x16xf32>
    %520 = tpu.matmul %519, %3, %cst_227 {dimension_numbers = #tpu.dot_dimension_numbers<[1], [0], [0], [1], [0, 0, 1, 1], [], []>} : vector<8x16xf32>, vector<16x16xf32>, vector<8x16xf32> -> vector<8x16xf32>
    %521 = arith.addf %520, %6 : vector<8x16xf32>
    %522 = math.tanh %521 : vector<8x16xf32>
    %523 = vector.extract_strided_slice %468 {offsets = [0, 0], sizes = [8, 1], strides = [1, 1]} : vector<8x16xf32> to vector<8x1xf32>
    %524 = vector.broadcast %523 : vector<8x1xf32> to vector<8x16xf32>
    %525 = arith.mulf %522, %524 : vector<8x16xf32>
    %526 = arith.addf %468, %525 : vector<8x16xf32>
    %527 = arith.addf %495, %511 : vector<8x16xf32>
    %cst_228 = arith.constant 3.000000e+00 : f32
    %528 = vector.broadcast %cst_228 : f32 to vector<8x16xf32>
    %529 = arith.mulf %528, %527 : vector<8x16xf32>
    %530 = arith.addf %480, %529 : vector<8x16xf32>
    %531 = arith.addf %530, %526 : vector<8x16xf32>
    %cst_229 = arith.constant 1.250000e-01 : f32
    %532 = vector.broadcast %cst_229 : f32 to vector<8x16xf32>
    %533 = arith.mulf %532, %531 : vector<8x16xf32>
    %534 = arith.addf %457, %533 : vector<8x16xf32>
    %c3_230 = arith.constant 3 : index
    %c0_231 = arith.constant 0 : index
    %c0_232 = arith.constant 0 : index
    %535 = vector.load %arg7[%c3_230, %c0_231, %c0_232] : memref<4x8x16xf32, #tpu.memory_space<vmem>>, vector<1x8x16xf32>
    %536 = vector.shape_cast %535 : vector<1x8x16xf32> to vector<8x16xf32>
    %537 = vector.shape_cast %534 : vector<8x16xf32> to vector<1x8x16xf32>
    tpu.vector_store %arg7[%c3_230, %c0_231, %c0_232], %537 {strides = array<i32>} : memref<4x8x16xf32, #tpu.memory_space<vmem>>, vector<1x8x16xf32>,
    %c0_233 = arith.constant 0 : index
    %c0_234 = arith.constant 0 : index
    %538 = vector.load %arg4[%c0_233, %c0_234] : memref<16x4xf32, #tpu.memory_space<vmem>>, vector<16x4xf32>
    %c0_235 = arith.constant 0 : index
    %c0_236 = arith.constant 0 : index
    %539 = vector.load %arg5[%c0_235, %c0_236] : memref<1x4xf32, #tpu.memory_space<vmem>>, vector<1x4xf32>
    %c0_237 = arith.constant 0 : index
    %c0_238 = arith.constant 0 : index
    %c0_239 = arith.constant 0 : index
    %540 = vector.load %arg7[%c0_237, %c0_238, %c0_239] : memref<4x8x16xf32, #tpu.memory_space<vmem>>, vector<1x8x16xf32>
    %541 = vector.shape_cast %540 : vector<1x8x16xf32> to vector<8x16xf32>
    %cst_240 = arith.constant dense<0.000000e+00> : vector<8x4xf32>
    %542 = tpu.matmul %541, %538, %cst_240 {dimension_numbers = #tpu.dot_dimension_numbers<[1], [0], [0], [1], [0, 0, 1, 1], [], []>} : vector<8x16xf32>, vector<16x4xf32>, vector<8x4xf32> -> vector<8x4xf32>
    %543 = vector.broadcast %539 : vector<1x4xf32> to vector<8x4xf32>
    %544 = arith.addf %542, %543 : vector<8x4xf32>
    %c0_241 = arith.constant 0 : index
    %c0_242 = arith.constant 0 : index
    %c0_243 = arith.constant 0 : index
    %545 = vector.load %arg6[%c0_241, %c0_242, %c0_243] : memref<4x8x4xf32, #tpu.memory_space<vmem>>, vector<1x8x4xf32>
    %546 = vector.shape_cast %545 : vector<1x8x4xf32> to vector<8x4xf32>
    %547 = vector.shape_cast %544 : vector<8x4xf32> to vector<1x8x4xf32>
    tpu.vector_store %arg6[%c0_241, %c0_242, %c0_243], %547 {strides = array<i32>} : memref<4x8x4xf32, #tpu.memory_space<vmem>>, vector<1x8x4xf32>,
    %c1_244 = arith.constant 1 : index
    %c0_245 = arith.constant 0 : index
    %c0_246 = arith.constant 0 : index
    %548 = vector.load %arg7[%c1_244, %c0_245, %c0_246] : memref<4x8x16xf32, #tpu.memory_space<vmem>>, vector<1x8x16xf32>
    %549 = vector.shape_cast %548 : vector<1x8x16xf32> to vector<8x16xf32>
    %cst_247 = arith.constant dense<0.000000e+00> : vector<8x4xf32>
    %550 = tpu.matmul %549, %538, %cst_247 {dimension_numbers = #tpu.dot_dimension_numbers<[1], [0], [0], [1], [0, 0, 1, 1], [], []>} : vector<8x16xf32>, vector<16x4xf32>, vector<8x4xf32> -> vector<8x4xf32>
    %551 = vector.broadcast %539 : vector<1x4xf32> to vector<8x4xf32>
    %552 = arith.addf %550, %551 : vector<8x4xf32>
    %c1_248 = arith.constant 1 : index
    %c0_249 = arith.constant 0 : index
    %c0_250 = arith.constant 0 : index
    %553 = vector.load %arg6[%c1_248, %c0_249, %c0_250] : memref<4x8x4xf32, #tpu.memory_space<vmem>>, vector<1x8x4xf32>
    %554 = vector.shape_cast %553 : vector<1x8x4xf32> to vector<8x4xf32>
    %555 = vector.shape_cast %552 : vector<8x4xf32> to vector<1x8x4xf32>
    tpu.vector_store %arg6[%c1_248, %c0_249, %c0_250], %555 {strides = array<i32>} : memref<4x8x4xf32, #tpu.memory_space<vmem>>, vector<1x8x4xf32>,
    %c2_251 = arith.constant 2 : index
    %c0_252 = arith.constant 0 : index
    %c0_253 = arith.constant 0 : index
    %556 = vector.load %arg7[%c2_251, %c0_252, %c0_253] : memref<4x8x16xf32, #tpu.memory_space<vmem>>, vector<1x8x16xf32>
    %557 = vector.shape_cast %556 : vector<1x8x16xf32> to vector<8x16xf32>
    %cst_254 = arith.constant dense<0.000000e+00> : vector<8x4xf32>
    %558 = tpu.matmul %557, %538, %cst_254 {dimension_numbers = #tpu.dot_dimension_numbers<[1], [0], [0], [1], [0, 0, 1, 1], [], []>} : vector<8x16xf32>, vector<16x4xf32>, vector<8x4xf32> -> vector<8x4xf32>
    %559 = vector.broadcast %539 : vector<1x4xf32> to vector<8x4xf32>
    %560 = arith.addf %558, %559 : vector<8x4xf32>
    %c2_255 = arith.constant 2 : index
    %c0_256 = arith.constant 0 : index
    %c0_257 = arith.constant 0 : index
    %561 = vector.load %arg6[%c2_255, %c0_256, %c0_257] : memref<4x8x4xf32, #tpu.memory_space<vmem>>, vector<1x8x4xf32>
    %562 = vector.shape_cast %561 : vector<1x8x4xf32> to vector<8x4xf32>
    %563 = vector.shape_cast %560 : vector<8x4xf32> to vector<1x8x4xf32>
    tpu.vector_store %arg6[%c2_255, %c0_256, %c0_257], %563 {strides = array<i32>} : memref<4x8x4xf32, #tpu.memory_space<vmem>>, vector<1x8x4xf32>,
    %c3_258 = arith.constant 3 : index
    %c0_259 = arith.constant 0 : index
    %c0_260 = arith.constant 0 : index
    %564 = vector.load %arg7[%c3_258, %c0_259, %c0_260] : memref<4x8x16xf32, #tpu.memory_space<vmem>>, vector<1x8x16xf32>
    %565 = vector.shape_cast %564 : vector<1x8x16xf32> to vector<8x16xf32>
    %cst_261 = arith.constant dense<0.000000e+00> : vector<8x4xf32>
    %566 = tpu.matmul %565, %538, %cst_261 {dimension_numbers = #tpu.dot_dimension_numbers<[1], [0], [0], [1], [0, 0, 1, 1], [], []>} : vector<8x16xf32>, vector<16x4xf32>, vector<8x4xf32> -> vector<8x4xf32>
    %567 = vector.broadcast %539 : vector<1x4xf32> to vector<8x4xf32>
    %568 = arith.addf %566, %567 : vector<8x4xf32>
    %c3_262 = arith.constant 3 : index
    %c0_263 = arith.constant 0 : index
    %c0_264 = arith.constant 0 : index
    %569 = vector.load %arg6[%c3_262, %c0_263, %c0_264] : memref<4x8x4xf32, #tpu.memory_space<vmem>>, vector<1x8x4xf32>
    %570 = vector.shape_cast %569 : vector<1x8x4xf32> to vector<8x4xf32>
    %571 = vector.shape_cast %568 : vector<8x4xf32> to vector<1x8x4xf32>
    tpu.vector_store %arg6[%c3_262, %c0_263, %c0_264], %571 {strides = array<i32>} : memref<4x8x4xf32, #tpu.memory_space<vmem>>, vector<1x8x4xf32>,
    return
  }
  func.func @transform_0(%arg0: i32) -> (i32, i32, i32, i32) {
    %c0_i32 = arith.constant 0 : i32
    %c0_i32_0 = arith.constant 0 : i32
    %c0_i32_1 = arith.constant 0 : i32
    %c0_i32_2 = arith.constant 0 : i32
    return %c0_i32, %c0_i32_0, %arg0, %c0_i32_1 : i32, i32, i32, i32
  }
  func.func @transform_1(%arg0: i32) -> (i32, i32) {
    %c0_i32 = arith.constant 0 : i32
    %c0_i32_0 = arith.constant 0 : i32
    %c0_i32_1 = arith.constant 0 : i32
    return %c0_i32, %c0_i32_0 : i32, i32
  }
  func.func @transform_2(%arg0: i32) -> (i32, i32) {
    %c0_i32 = arith.constant 0 : i32
    %c0_i32_0 = arith.constant 0 : i32
    %c0_i32_1 = arith.constant 0 : i32
    return %c0_i32, %c0_i32_0 : i32, i32
  }
  func.func @transform_3(%arg0: i32) -> (i32, i32) {
    %c0_i32 = arith.constant 0 : i32
    %c0_i32_0 = arith.constant 0 : i32
    %c0_i32_1 = arith.constant 0 : i32
    return %c0_i32, %c0_i32_0 : i32, i32
  }
  func.func @transform_4(%arg0: i32) -> (i32, i32) {
    %c0_i32 = arith.constant 0 : i32
    %c0_i32_0 = arith.constant 0 : i32
    %c0_i32_1 = arith.constant 0 : i32
    return %c0_i32, %c0_i32_0 : i32, i32
  }
  func.func @transform_5(%arg0: i32) -> (i32, i32, i32) {
    %c0_i32 = arith.constant 0 : i32
    %c0_i32_0 = arith.constant 0 : i32
    %c0_i32_1 = arith.constant 0 : i32
    return %c0_i32, %arg0, %c0_i32_0 : i32, i32, i32
  }
}

</mosaic_0001>

<bundles_post_ra>
// kernel: tpu_custom_call.1
= control target key start
LH: loop header
LB: loop body
LE: loop exit
PB: predicated region body
PF: predicated region fallthrough
CT: control target
= control target key end

     0   :  { %10 = vsyncpa [#allocation4], 0  ;;  %s3341_s18 = smov [#allocation3]   ;;  %s3893_s0 = inlined_call_operand.hbm [shape: f32[7,4,8,16], index: 0, kind: input, shape index: {}]   ;;  %s3894_s1 = inlined_call_operand.vmem [shape: f32[16,16], index: 1, kind: input, shape index: {}]   ;;  %s3895_s2 = inlined_call_operand.vmem [shape: f32[1,16], index: 2, kind: input, shape index: {}]   ;;  %s3896_s3 = inlined_call_operand.vmem [shape: f32[16,4], index: 3, kind: input, shape index: {}]   ;;  %s3897_s4 = inlined_call_operand.vmem [shape: f32[1,4], index: 4, kind: input, shape index: {}]   ;;  %s3898_s5 = inlined_call_operand.vmem [shape: f32[4,8,4], index: 5, kind: output, shape index: {}]  }
   0x1   :  { %s16_s19 = sshll.u32 %s3341_s18, 4  ;;  %s17_s19 = int_to_ptr.vmem [resolvable:$true] %s16_s19 }
   0x2   :  { %s3327_s20 = scalar_lea.vmem %s17_s19, 3584  ;;  %p3332_p1 = scmp.lt.s32.totalorder %s17_s19, %s17_s19 }
   0x3   :  { %p3328_p0 = scmp.ne.s32.totalorder %s17_s19, %s3327_s20  ;;  %p3333_p2 = scmp.lt.s32.totalorder %s3327_s20, %s3327_s20 }
   0x5   :  { %p3334_p3 = por %p3333_p2, %p3332_p1 }
   0x7   :  { %p3335_p4 = pnand %p3334_p3, %p3328_p0 }
   0x9   :  { %3338 = shalt.err (!%p3335_p4)
}
   0xa   :  { %s3342_s21 = smov 128   ;;  %s3343_s22 = smov 8  }
   0xb   :  { %22 = dma.hbm_to_vmem [thread:$0]  %s3893_s0, 3584, %s17_s19, [#allocation4], %s3342_s21, %s3342_s21, %s3343_s22  }
   0xc   :  { %3339 = dma.done.wait [#allocation4], 3584  }
   0xd   :  { %3340 = vsyncadd [#allocation4], 4294963712  ;;  %v3344_v0 = vmov 0.0   ;;  %vm3345_vm0 = vmmov 0   ;;  %v3346_v1 = vmov 0   ;;  %v3389_v2 = vld [vmem:[%s3894_s1 + $0x8] sm:$0xff]  ;;  %v34_v22 = vlaneseq }
   0xe   :  { %3026 = vmatprep.subr.mxu0 %v3344_v0  ;;  %3030 = vmatprep.mubr.msk.f32.mxu0 %vm3345_vm0, %v3344_v0  ;;  %v3394_v3 = vld [vmem:[%s3894_s1] sm:$0xff]  ;;  %v3398_v5 = vld [vmem:[#allocation3 + $0x8] sm:$0xff]  ;;  %v3417_v7 = vld [vmem:[#allocation3 + $0x30] sm:$0xff]  ;;  %vm53_vm2 = vcmask 130048   ;;  %vm2632_vm3 = vcmask 31744  }
   0xf   :  { %3256 = vset.pattern.permute.xlu0 %v3346_v1  ;;  %3033 = vmatprep.subr.mxu1 %v3344_v0  ;;  %v46_v4 = vld [vmem:[#allocation3] sm:$0xff]  ;;  %v3423_v9 = vld [vmem:[#allocation3 + $0x50] sm:$0xff]  ;;  %v3453_v26 = vand.u32 127, %v34_v22  ;;  %v3468_v32 = vld [vmem:[#allocation3 + $0x18] sm:$0xff] }
  0x10   :  { %3037 = vmatprep.mubr.msk.f32.mxu1 %vm3345_vm0, %v3344_v0  ;;  %3257 = vset.pattern.permute.xlu1 %v3346_v1  ;;  %v3407_v6 = vld [vmem:[#allocation3 + $0x20] sm:$0xff]  ;;  %v3429_v11 = vld [vmem:[#allocation3 + $0x70] sm:$0xff]  ;;  %v3471_v33 = vld [vmem:[#allocation3 + $0x28] sm:$0xff] }
  0x11   :  { %3027 = vmatpush3.msra.mxu0 %v3389_v2  ;;  %130 = vperm.xlu0 %3256, %v46_v4   ;;  %v3420_v8 = vld [vmem:[#allocation3 + $0x40] sm:$0xff]  ;;  %v3435_v13 = vld [vmem:[#allocation3 + $0x90] sm:$0xff]  ;;  %vm36_vm1 = vcmp.ge.s32.totalorder %v3453_v26, 4  ;;  %v3474_v34 = vld [vmem:[#allocation3 + $0x38] sm:$0xff] }
  0x12   :  { %3028 = vmatprep.subr.mxu0 %v3344_v0  ;;  %3034 = vmatpush3.msra.mxu1 %v3389_v2  ;;  %v3426_v10 = vld [vmem:[#allocation3 + $0x60] sm:$0xff]  ;;  %v3441_v15 = vld [vmem:[#allocation3 + $0xb0] sm:$0xff]  ;;  %v3477_v35 = vld [vmem:[#allocation3 + $0x48] sm:$0xff] }
  0x13   :  { %3029 = vmatpush3.msra.mxu0 %v3394_v3  ;;  %3035 = vmatprep.subr.mxu1 %v3344_v0  ;;  %v3432_v12 = vld [vmem:[#allocation3 + $0x80] sm:$0xff]  ;;  %v2195_v17 = vld [vmem:[#allocation3 + $0xd0] sm:$0xff]  ;;  %v3480_v36 = vld [vmem:[#allocation3 + $0x58] sm:$0xff] }
  0x14   :  { %3031 = vmatmul.mubr.f32.vlgmr.msra.gmra.mxu0 %v3344_v0  ;;  %3036 = vmatpush3.msra.mxu1 %v3394_v3  ;;  %v3438_v14 = vld [vmem:[#allocation3 + $0xa0] sm:$0xff]  ;;  %v50_v31 = vld [vmem:[#allocation3 + $0x10] sm:$0xff]  ;;  %v3483_v37 = vld [vmem:[#allocation3 + $0x68] sm:$0xff] }
  0x15   :  { %216 = vperm.xlu0 %3256, %v3398_v5   ;;  %3040 = vmatprep.subr.mxu0 %v3344_v0  ;;  %v3444_v16 = vld [vmem:[#allocation3 + $0xc0] sm:$0xff]  ;;  %v3486_v38 = vld [vmem:[#allocation3 + $0x78] sm:$0xff]  ;;  %v3489_v39 = vld [vmem:[#allocation3 + $0x88] sm:$0xff] }
  0x16   :  { %3041 = vmatpush3.msra.mxu0 %v3389_v2  ;;  %3044 = vmatprep.mubr.msk.f32.mxu0 %vm3345_vm0, %v3344_v0  ;;  %v3450_v18 = vld [vmem:[%s3895_s2] ss:$0 sm:$0xff]  ;;  %v3492_v40 = vld [vmem:[#allocation3 + $0x98] sm:$0xff]  ;;  %v3495_v41 = vld [vmem:[#allocation3 + $0xa8] sm:$0xff] }
  0x17   :  { %3042 = vmatprep.subr.mxu0 %v3344_v0  ;;  %3047 = vmatprep.subr.mxu1 %v3344_v0  ;;  %v3498_v42 = vld [vmem:[#allocation3 + $0xb8] sm:$0xff]  ;;  %v3501_v43 = vld [vmem:[#allocation3 + $0xc8] sm:$0xff] }
  0x18   :  { %3043 = vmatpush3.msra.mxu0 %v3394_v3  ;;  %302 = vperm.xlu1 %3257, %v50_v31   ;;  %v2197_v44 = vld [vmem:[#allocation3 + $0xd8] sm:$0xff] }
  0x19   :  { %487 = vperm.xlu0 %3256, %v3407_v6   ;;  %3054 = vmatprep.subr.mxu0 %v3344_v0 }
  0x1c   :  { %389 = vperm.xlu1 %3257, %v3468_v32  }
  0x1d   :  { %659 = vperm.xlu0 %3256, %v3417_v7  }
  0x20   :  { %573 = vperm.xlu1 %3257, %v3471_v33  }
  0x21   :  { %844 = vperm.xlu0 %3256, %v3420_v8  }
  0x24   :  { %746 = vperm.xlu1 %3257, %v3474_v34  }
  0x25   :  { %1016 = vperm.xlu0 %3256, %v3423_v9  }
  0x28   :  { %930 = vperm.xlu1 %3257, %v3477_v35  }
  0x29   :  { %1201 = vperm.xlu0 %3256, %v3426_v10  }
  0x2c   :  { %1103 = vperm.xlu1 %3257, %v3480_v36  }
  0x2d   :  { %1373 = vperm.xlu0 %3256, %v3429_v11  }
  0x30   :  { %1287 = vperm.xlu1 %3257, %v3483_v37  }
  0x31   :  { %1559 = vperm.xlu0 %3256, %v3432_v12  }
  0x34   :  { %1460 = vperm.xlu1 %3257, %v3486_v38  }
  0x35   :  { %1731 = vperm.xlu0 %3256, %v3435_v13  }
  0x38   :  { %1645 = vperm.xlu1 %3257, %v3489_v39  }
  0x39   :  { %1918 = vperm.xlu0 %3256, %v3438_v14  }
  0x3c   :  { %1818 = vperm.xlu1 %3257, %v3492_v40  }
  0x3d   :  { %2090 = vperm.xlu0 %3256, %v3441_v15  }
  0x40   :  { %2004 = vperm.xlu1 %3257, %v3495_v41  }
  0x41   :  { %2277 = vperm.xlu0 %3256, %v3444_v16  }
  0x44   :  { %2177 = vperm.xlu1 %3257, %v3498_v42  }
  0x45   :  { %2449 = vperm.xlu0 %3256, %v2195_v17  }
  0x48   :  { %2363 = vperm.xlu1 %3257, %v3501_v43  }
  0x4c   :  { %2536 = vperm.xlu1 %3257, %v2197_v44  }
  0x8c   :  { %v131_v24 = vpop.permute.xlu0 %130 }
  0x90   :  { %v217_v49 = vpop.permute.xlu0 %216 }
  0x93   :  { %v303_v59 = vpop.permute.xlu1 %302 }
  0xd4   :  { %v123_v19 = vpop.f32.mrf.mxu0 }
  0xd5   :  { %v124_v20 = vadd.f32 %v3450_v18, %v123_v19 }
  0xd6   :  { %v3032_v21 = vpop.f32.mrf.mxu0 }
  0xd7   :  { %3258 = vtanh.f32 %v124_v20 }
  0xe4   :  { %v3259_v23 = vpop.eup %3258 }
  0xe5   :  { %v133_v25 = vmul.f32 %v3259_v23, %v131_v24  ;;  %v390_v23 = vpop.permute.xlu1 %389 }
  0xe7   :  { %v3455_v27 = vadd.f32 %v133_v25, %v46_v4 }
  0xe9   :  { %v135_v28 = vmul.f32 0.33333334, %v3455_v27 }
  0xeb   :  { %v2868_v29 = vclamps-f32 %v135_v28, 1.0 }
  0xed   :  { %v139_v30 = vsel %vm36_vm1, %v2868_v29, %v135_v28 }
  0xee   :  { %3038 = vmatmul.mubr.msk.f32.vlgmr.msra.gmra.mxu1 %vm53_vm2, %v139_v30 }
  0xef   :  { %3048 = vmatpush3.msra.mxu1 %v3389_v2  ;;  %3051 = vmatprep.mubr.msk.f32.mxu1 %vm3345_vm0, %v3344_v0 }
  0xf0   :  { %3049 = vmatprep.subr.mxu1 %v3344_v0 }
  0xf1   :  { %3050 = vmatpush3.msra.mxu1 %v3394_v3 }
  0xf2   :  { %3061 = vmatprep.subr.mxu1 %v3344_v0 }
 0x1ae   :  { %v209_v45 = vpop.f32.mrf.mxu1 }
 0x1af   :  { %v210_v46 = vadd.f32 %v3450_v18, %v209_v45 }
 0x1b0   :  { %v3039_v47 = vpop.f32.mrf.mxu1 }
 0x1b1   :  { %3260 = vtanh.f32 %v210_v46  ;;  %v488_v47 = vpop.permute.xlu0 %487 }
 0x1be   :  { %v3261_v48 = vpop.eup %3260 }
 0x1bf   :  { %v219_v50 = vmul.f32 %v3261_v48, %v217_v49 }
 0x1c1   :  { %v220_v51 = vadd.f32 %v219_v50, %v3398_v5 }
 0x1c3   :  { %v221_v52 = vsub.f32 %v220_v51, %v135_v28  ;;  %v307_v62 = vsub.f32 %v3455_v27, %v220_v51 }
 0x1c5   :  { %v2870_v53 = vclamps-f32 %v221_v52, 1.0 }
 0x1c7   :  { %v225_v54 = vsel %vm36_vm1, %v2870_v53, %v221_v52 }
 0x1c8   :  { %3045 = vmatmul.mubr.msk.f32.vlgmr.msra.gmra.mxu0 %vm53_vm2, %v225_v54 }
 0x1c9   :  { %3055 = vmatpush3.msra.mxu0 %v3389_v2  ;;  %3058 = vmatprep.mubr.msk.f32.mxu0 %vm3345_vm0, %v3344_v0 }
 0x1ca   :  { %3056 = vmatprep.subr.mxu0 %v3344_v0 }
 0x1cb   :  { %3057 = vmatpush3.msra.mxu0 %v3394_v3 }
 0x1cc   :  { %3068 = vmatprep.subr.mxu0 %v3344_v0 }
 0x288   :  { %v295_v55 = vpop.f32.mrf.mxu0 }
 0x289   :  { %v296_v56 = vadd.f32 %v3450_v18, %v295_v55 }
 0x28a   :  { %v3046_v57 = vpop.f32.mrf.mxu0 }
 0x28b   :  { %3262 = vtanh.f32 %v296_v56  ;;  %v574_v57 = vpop.permute.xlu1 %573 }
 0x298   :  { %v3263_v58 = vpop.eup %3262 }
 0x299   :  { %v305_v60 = vmul.f32 %v3263_v58, %v303_v59 }
 0x29b   :  { %v306_v61 = vadd.f32 %v305_v60, %v50_v31 }
 0x29d   :  { %v308_v63 = vadd.f32 %v307_v62, %v306_v61  ;;  %v394_v20 = vadd.f32 %v306_v61, %v220_v51 }
 0x29f   :  { %v2872_v1 = vclamps-f32 %v308_v63, 1.0  ;;  %v395_v21 = vmul.f32 3.0, %v394_v20 }
 0x2a1   :  { %v312_v4 = vsel %vm36_vm1, %v2872_v1, %v308_v63  ;;  %v396_v25 = vadd.f32 %v395_v21, %v3455_v27 }
 0x2a2   :  { %3052 = vmatmul.mubr.msk.f32.vlgmr.msra.gmra.mxu1 %vm53_vm2, %v312_v4 }
 0x2a3   :  { %3062 = vmatpush3.msra.mxu1 %v3389_v2  ;;  %3065 = vmatprep.mubr.msk.f32.mxu1 %vm3345_vm0, %v3344_v0 }
 0x2a4   :  { %3063 = vmatprep.subr.mxu1 %v3344_v0 }
 0x2a5   :  { %3064 = vmatpush3.msra.mxu1 %v3394_v3 }
 0x2a6   :  { %3075 = vmatprep.subr.mxu1 %v3344_v0 }
 0x362   :  { %v382_v5 = vpop.f32.mrf.mxu1 }
 0x363   :  { %v383_v17 = vadd.f32 %v3450_v18, %v382_v5 }
 0x364   :  { %v3053_v19 = vpop.f32.mrf.mxu1 }
 0x365   :  { %3264 = vtanh.f32 %v383_v17  ;;  %v660_v17 = vpop.permute.xlu0 %659 }
 0x372   :  { %v3265_v22 = vpop.eup %3264 }
 0x373   :  { %v392_v24 = vmul.f32 %v3265_v22, %v390_v23 }
 0x375   :  { %v393_v28 = vadd.f32 %v392_v24, %v3468_v32 }
 0x377   :  { %v397_v29 = vadd.f32 %v396_v25, %v393_v28 }
 0x379   :  { %v3529_v30 = vmul.f32 0.125, %v397_v29 }
 0x37b   :  { %v2874_v31 = vclamps-f32 %v3529_v30, 1.0 }
 0x37d   :  { %v410_v44 = vsel %vm36_vm1, %v2874_v31, %v3529_v30 }
 0x37e   :  { %3059 = vmatmul.mubr.msk.f32.vlgmr.msra.gmra.mxu0 %vm53_vm2, %v410_v44 }
 0x37f   :  { %3069 = vmatpush3.msra.mxu0 %v3389_v2  ;;  %3072 = vmatprep.mubr.msk.f32.mxu0 %vm3345_vm0, %v3344_v0 }
 0x380   :  { %3070 = vmatprep.subr.mxu0 %v3344_v0 }
 0x381   :  { %3071 = vmatpush3.msra.mxu0 %v3394_v3 }
 0x382   :  { %3082 = vmatprep.subr.mxu0 %v3344_v0 }
 0x43e   :  { %v480_v27 = vpop.f32.mrf.mxu0 }
 0x43f   :  { %v481_v32 = vadd.f32 %v3450_v18, %v480_v27 }
 0x440   :  { %v3060_v45 = vpop.f32.mrf.mxu0 }
 0x441   :  { %3266 = vtanh.f32 %v481_v32  ;;  %v747_v32 = vpop.permute.xlu1 %746 }
 0x44e   :  { %v3267_v46 = vpop.eup %3266 }
 0x44f   :  { %v490_v48 = vmul.f32 %v3267_v46, %v488_v47 }
 0x451   :  { %v491_v49 = vadd.f32 %v490_v48, %v3407_v6 }
 0x453   :  { %v492_v50 = vmul.f32 0.33333334, %v491_v49 }
 0x455   :  { %v493_v51 = vadd.f32 %v492_v50, %v3529_v30 }
 0x457   :  { %v2876_v52 = vclamps-f32 %v493_v51, 1.0 }
 0x459   :  { %v496_v53 = vsel %vm36_vm1, %v2876_v52, %v493_v51 }
 0x45a   :  { %3066 = vmatmul.mubr.msk.f32.vlgmr.msra.gmra.mxu1 %vm53_vm2, %v496_v53 }
 0x45b   :  { %3076 = vmatpush3.msra.mxu1 %v3389_v2  ;;  %3079 = vmatprep.mubr.msk.f32.mxu1 %vm3345_vm0, %v3344_v0 }
 0x45c   :  { %3077 = vmatprep.subr.mxu1 %v3344_v0 }
 0x45d   :  { %3078 = vmatpush3.msra.mxu1 %v3394_v3 }
 0x45e   :  { %3089 = vmatprep.subr.mxu1 %v3344_v0 }
 0x51a   :  { %v566_v6 = vpop.f32.mrf.mxu1 }
 0x51b   :  { %v567_v54 = vadd.f32 %v3450_v18, %v566_v6 }
 0x51c   :  { %v3067_v55 = vpop.f32.mrf.mxu1 }
 0x51d   :  { %3268 = vtanh.f32 %v567_v54  ;;  %v845_v54 = vpop.permute.xlu0 %844 }
 0x52a   :  { %v3269_v56 = vpop.eup %3268 }
 0x52b   :  { %v576_v58 = vmul.f32 %v3269_v56, %v574_v57 }
 0x52d   :  { %v577_v59 = vadd.f32 %v576_v58, %v3471_v33 }
 0x52f   :  { %v578_v60 = vsub.f32 %v577_v59, %v492_v50  ;;  %v664_v21 = vsub.f32 %v491_v49, %v577_v59 }
 0x531   :  { %v579_v61 = vadd.f32 %v578_v60, %v3529_v30 }
 0x533   :  { %v2878_v62 = vclamps-f32 %v579_v61, 1.0 }
 0x535   :  { %v582_v63 = vsel %vm36_vm1, %v2878_v62, %v579_v61 }
 0x536   :  { %3073 = vmatmul.mubr.msk.f32.vlgmr.msra.gmra.mxu0 %vm53_vm2, %v582_v63 }
 0x537   :  { %3083 = vmatpush3.msra.mxu0 %v3389_v2  ;;  %3086 = vmatprep.mubr.msk.f32.mxu0 %vm3345_vm0, %v3344_v0 }
 0x538   :  { %3084 = vmatprep.subr.mxu0 %v3344_v0 }
 0x539   :  { %3085 = vmatpush3.msra.mxu0 %v3394_v3 }
 0x53a   :  { %3096 = vmatprep.subr.mxu0 %v3344_v0 }
 0x5f6   :  { %v652_v33 = vpop.f32.mrf.mxu0 }
 0x5f7   :  { %v653_v1 = vadd.f32 %v3450_v18, %v652_v33  ;;  %v931_v33 = vpop.permute.xlu1 %930 }
 0x5f8   :  { %v3074_v4 = vpop.f32.mrf.mxu0 }
 0x5f9   :  { %3270 = vtanh.f32 %v653_v1 }
 0x606   :  { %v3271_v5 = vpop.eup %3270 }
 0x607   :  { %v662_v19 = vmul.f32 %v3271_v5, %v660_v17 }
 0x609   :  { %v663_v20 = vadd.f32 %v662_v19, %v3417_v7 }
 0x60b   :  { %v665_v22 = vadd.f32 %v664_v21, %v663_v20  ;;  %v751_v31 = vadd.f32 %v663_v20, %v577_v59 }
 0x60d   :  { %v666_v23 = vadd.f32 %v665_v22, %v3529_v30  ;;  %v752_v44 = vmul.f32 3.0, %v751_v31 }
 0x60f   :  { %v2880_v24 = vclamps-f32 %v666_v23, 1.0  ;;  %v753_v46 = vadd.f32 %v752_v44, %v491_v49 }
 0x611   :  { %v669_v25 = vsel %vm36_vm1, %v2880_v24, %v666_v23  ;;  %v1017_v24 = vpop.permute.xlu0 %1016 }
 0x612   :  { %3080 = vmatmul.mubr.msk.f32.vlgmr.msra.gmra.mxu1 %vm53_vm2, %v669_v25 }
 0x613   :  { %3090 = vmatpush3.msra.mxu1 %v3389_v2  ;;  %3093 = vmatprep.mubr.msk.f32.mxu1 %vm3345_vm0, %v3344_v0 }
 0x614   :  { %3091 = vmatprep.subr.mxu1 %v3344_v0 }
 0x615   :  { %3092 = vmatpush3.msra.mxu1 %v3394_v3 }
 0x616   :  { %3103 = vmatprep.subr.mxu1 %v3344_v0 }
 0x6d2   :  { %v739_v7 = vpop.f32.mrf.mxu1 }
 0x6d3   :  { %v740_v28 = vadd.f32 %v3450_v18, %v739_v7 }
 0x6d4   :  { %v3081_v29 = vpop.f32.mrf.mxu1 }
 0x6d5   :  { %3272 = vtanh.f32 %v740_v28 }
 0x6e2   :  { %v3273_v27 = vpop.eup %3272 }
 0x6e3   :  { %v749_v45 = vmul.f32 %v3273_v27, %v747_v32 }
 0x6e5   :  { %v750_v47 = vadd.f32 %v749_v45, %v3474_v34 }
 0x6e7   :  { %v754_v48 = vadd.f32 %v753_v46, %v750_v47 }
 0x6e9   :  { %v755_v50 = vmul.f32 0.125, %v754_v48 }
 0x6eb   :  { %v3581_v51 = vadd.f32 %v755_v50, %v3529_v30  ;;  %v1104_v50 = vpop.permute.xlu1 %1103 }
 0x6ed   :  { %v2882_v52 = vclamps-f32 %v3581_v51, 1.0 }
 0x6ef   :  { %v767_v53 = vsel %vm36_vm1, %v2882_v52, %v3581_v51 }
 0x6f0   :  { %3087 = vmatmul.mubr.msk.f32.vlgmr.msra.gmra.mxu0 %vm53_vm2, %v767_v53 }
 0x6f1   :  { %3097 = vmatpush3.msra.mxu0 %v3389_v2  ;;  %3100 = vmatprep.mubr.msk.f32.mxu0 %vm3345_vm0, %v3344_v0 }
 0x6f2   :  { %3098 = vmatprep.subr.mxu0 %v3344_v0 }
 0x6f3   :  { %3099 = vmatpush3.msra.mxu0 %v3394_v3 }
 0x6f4   :  { %3110 = vmatprep.subr.mxu0 %v3344_v0 }
 0x7b0   :  { %v837_v34 = vpop.f32.mrf.mxu0 }
 0x7b1   :  { %v838_v30 = vadd.f32 %v3450_v18, %v837_v34 }
 0x7b2   :  { %v3088_v49 = vpop.f32.mrf.mxu0 }
 0x7b3   :  { %3274 = vtanh.f32 %v838_v30 }
 0x7c0   :  { %v3275_v6 = vpop.eup %3274 }
 0x7c1   :  { %v847_v55 = vmul.f32 %v3275_v6, %v845_v54 }
 0x7c3   :  { %v848_v56 = vadd.f32 %v847_v55, %v3420_v8 }
 0x7c5   :  { %v849_v57 = vmul.f32 0.33333334, %v848_v56 }
 0x7c7   :  { %v850_v58 = vadd.f32 %v849_v57, %v3581_v51 }
 0x7c9   :  { %v2884_v59 = vclamps-f32 %v850_v58, 1.0 }
 0x7cb   :  { %v853_v60 = vsel %vm36_vm1, %v2884_v59, %v850_v58  ;;  %v1202_v58 = vpop.permute.xlu0 %1201 }
 0x7cc   :  { %3094 = vmatmul.mubr.msk.f32.vlgmr.msra.gmra.mxu1 %vm53_vm2, %v853_v60 }
 0x7cd   :  { %3104 = vmatpush3.msra.mxu1 %v3389_v2  ;;  %3107 = vmatprep.mubr.msk.f32.mxu1 %vm3345_vm0, %v3344_v0 }
 0x7ce   :  { %3105 = vmatprep.subr.mxu1 %v3344_v0 }
 0x7cf   :  { %3106 = vmatpush3.msra.mxu1 %v3394_v3 }
 0x7d0   :  { %3117 = vmatprep.subr.mxu1 %v3344_v0 }
 0x88c   :  { %v923_v8 = vpop.f32.mrf.mxu1 }
 0x88d   :  { %v924_v61 = vadd.f32 %v3450_v18, %v923_v8 }
 0x88e   :  { %v3095_v62 = vpop.f32.mrf.mxu1 }
 0x88f   :  { %3276 = vtanh.f32 %v924_v61 }
 0x89c   :  { %v3277_v63 = vpop.eup %3276 }
 0x89d   :  { %v933_v1 = vmul.f32 %v3277_v63, %v931_v33 }
 0x89f   :  { %v934_v4 = vadd.f32 %v933_v1, %v3477_v35 }
 0x8a1   :  { %v935_v5 = vsub.f32 %v934_v4, %v849_v57  ;;  %v1021_v28 = vsub.f32 %v848_v56, %v934_v4 }
 0x8a3   :  { %v936_v17 = vadd.f32 %v935_v5, %v3581_v51  ;;  %v1288_v5 = vpop.permute.xlu1 %1287 }
 0x8a5   :  { %v2886_v19 = vclamps-f32 %v936_v17, 1.0 }
 0x8a7   :  { %v939_v20 = vsel %vm36_vm1, %v2886_v19, %v936_v17 }
 0x8a8   :  { %3101 = vmatmul.mubr.msk.f32.vlgmr.msra.gmra.mxu0 %vm53_vm2, %v939_v20 }
 0x8a9   :  { %3111 = vmatpush3.msra.mxu0 %v3389_v2  ;;  %3114 = vmatprep.mubr.msk.f32.mxu0 %vm3345_vm0, %v3344_v0 }
 0x8aa   :  { %3112 = vmatprep.subr.mxu0 %v3344_v0 }
 0x8ab   :  { %3113 = vmatpush3.msra.mxu0 %v3394_v3 }
 0x8ac   :  { %3124 = vmatprep.subr.mxu0 %v3344_v0 }
 0x968   :  { %v1009_v35 = vpop.f32.mrf.mxu0 }
 0x969   :  { %v1010_v21 = vadd.f32 %v3450_v18, %v1009_v35 }
 0x96a   :  { %v3102_v22 = vpop.f32.mrf.mxu0 }
 0x96b   :  { %3278 = vtanh.f32 %v1010_v21 }
 0x978   :  { %v3279_v23 = vpop.eup %3278 }
 0x979   :  { %v1019_v25 = vmul.f32 %v3279_v23, %v1017_v24 }
 0x97b   :  { %v1020_v7 = vadd.f32 %v1019_v25, %v3423_v9 }
 0x97d   :  { %v1022_v29 = vadd.f32 %v1021_v28, %v1020_v7  ;;  %v1108_v46 = vadd.f32 %v1020_v7, %v934_v4  ;;  %v1374_v7 = vpop.permute.xlu0 %1373 }
 0x97f   :  { %v1023_v31 = vadd.f32 %v1022_v29, %v3581_v51  ;;  %v1109_v47 = vmul.f32 3.0, %v1108_v46 }
 0x981   :  { %v2888_v44 = vclamps-f32 %v1023_v31, 1.0  ;;  %v1110_v53 = vadd.f32 %v1109_v47, %v848_v56 }
 0x983   :  { %v1026_v27 = vsel %vm36_vm1, %v2888_v44, %v1023_v31 }
 0x984   :  { %3108 = vmatmul.mubr.msk.f32.vlgmr.msra.gmra.mxu1 %vm53_vm2, %v1026_v27 }
 0x985   :  { %3118 = vmatpush3.msra.mxu1 %v3389_v2  ;;  %3121 = vmatprep.mubr.msk.f32.mxu1 %vm3345_vm0, %v3344_v0 }
 0x986   :  { %3119 = vmatprep.subr.mxu1 %v3344_v0 }
 0x987   :  { %3120 = vmatpush3.msra.mxu1 %v3394_v3 }
 0x988   :  { %3131 = vmatprep.subr.mxu1 %v3344_v0 }
 0xa44   :  { %v1096_v9 = vpop.f32.mrf.mxu1 }
 0xa45   :  { %v1097_v32 = vadd.f32 %v3450_v18, %v1096_v9 }
 0xa46   :  { %v3109_v45 = vpop.f32.mrf.mxu1 }
 0xa47   :  { %3280 = vtanh.f32 %v1097_v32 }
 0xa54   :  { %v3281_v48 = vpop.eup %3280 }
 0xa55   :  { %v1106_v52 = vmul.f32 %v3281_v48, %v1104_v50 }
 0xa57   :  { %v1107_v34 = vadd.f32 %v1106_v52, %v3480_v36  ;;  %v1461_v52 = vpop.permute.xlu1 %1460 }
 0xa59   :  { %v1111_v30 = vadd.f32 %v1110_v53, %v1107_v34 }
 0xa5b   :  { %v1112_v49 = vmul.f32 0.125, %v1111_v30 }
 0xa5d   :  { %v3633_v6 = vadd.f32 %v1112_v49, %v3581_v51 }
 0xa5f   :  { %v2890_v54 = vclamps-f32 %v3633_v6, 1.0 }
 0xa61   :  { %v1124_v55 = vsel %vm36_vm1, %v2890_v54, %v3633_v6 }
 0xa62   :  { %3115 = vmatmul.mubr.msk.f32.vlgmr.msra.gmra.mxu0 %vm53_vm2, %v1124_v55 }
 0xa63   :  { %3125 = vmatpush3.msra.mxu0 %v3389_v2  ;;  %3128 = vmatprep.mubr.msk.f32.mxu0 %vm3345_vm0, %v3344_v0 }
 0xa64   :  { %3126 = vmatprep.subr.mxu0 %v3344_v0 }
 0xa65   :  { %3127 = vmatpush3.msra.mxu0 %v3394_v3 }
 0xa66   :  { %3138 = vmatprep.subr.mxu0 %v3344_v0 }
 0xb22   :  { %v1194_v36 = vpop.f32.mrf.mxu0 }
 0xb23   :  { %v1195_v51 = vadd.f32 %v3450_v18, %v1194_v36 }
 0xb24   :  { %v3116_v56 = vpop.f32.mrf.mxu0 }
 0xb25   :  { %3282 = vtanh.f32 %v1195_v51 }
 0xb32   :  { %v3283_v57 = vpop.eup %3282 }
 0xb33   :  { %v1204_v59 = vmul.f32 %v3283_v57, %v1202_v58  ;;  %v1560_v58 = vpop.permute.xlu0 %1559 }
 0xb35   :  { %v1205_v60 = vadd.f32 %v1204_v59, %v3426_v10 }
 0xb37   :  { %v1206_v8 = vmul.f32 0.33333334, %v1205_v60 }
 0xb39   :  { %v1207_v61 = vadd.f32 %v1206_v8, %v3633_v6 }
 0xb3b   :  { %v2892_v62 = vclamps-f32 %v1207_v61, 1.0 }
 0xb3d   :  { %v1210_v63 = vsel %vm36_vm1, %v2892_v62, %v1207_v61 }
 0xb3e   :  { %3122 = vmatmul.mubr.msk.f32.vlgmr.msra.gmra.mxu1 %vm53_vm2, %v1210_v63 }
 0xb3f   :  { %3132 = vmatpush3.msra.mxu1 %v3389_v2  ;;  %3135 = vmatprep.mubr.msk.f32.mxu1 %vm3345_vm0, %v3344_v0 }
 0xb40   :  { %3133 = vmatprep.subr.mxu1 %v3344_v0 }
 0xb41   :  { %3134 = vmatpush3.msra.mxu1 %v3394_v3 }
 0xb42   :  { %3145 = vmatprep.subr.mxu1 %v3344_v0 }
 0xbfe   :  { %v1280_v10 = vpop.f32.mrf.mxu1 }
 0xbff   :  { %v1281_v33 = vadd.f32 %v3450_v18, %v1280_v10 }
 0xc00   :  { %v3123_v1 = vpop.f32.mrf.mxu1 }
 0xc01   :  { %3284 = vtanh.f32 %v1281_v33 }
 0xc0e   :  { %v3285_v4 = vpop.eup %3284 }
 0xc0f   :  { %v1290_v17 = vmul.f32 %v3285_v4, %v1288_v5  ;;  %v1646_v4 = vpop.permute.xlu1 %1645 }
 0xc11   :  { %v1291_v19 = vadd.f32 %v1290_v17, %v3483_v37 }
 0xc13   :  { %v1292_v20 = vsub.f32 %v1291_v19, %v1206_v8  ;;  %v1378_v31 = vsub.f32 %v1205_v60, %v1291_v19 }
 0xc15   :  { %v1293_v35 = vadd.f32 %v1292_v20, %v3633_v6 }
 0xc17   :  { %v2894_v21 = vclamps-f32 %v1293_v35, 1.0 }
 0xc19   :  { %v1296_v22 = vsel %vm36_vm1, %v2894_v21, %v1293_v35 }
 0xc1a   :  { %3129 = vmatmul.mubr.msk.f32.vlgmr.msra.gmra.mxu0 %vm53_vm2, %v1296_v22 }
 0xc1b   :  { %3139 = vmatpush3.msra.mxu0 %v3389_v2  ;;  %3142 = vmatprep.mubr.msk.f32.mxu0 %vm3345_vm0, %v3344_v0 }
 0xc1c   :  { %3140 = vmatprep.subr.mxu0 %v3344_v0 }
 0xc1d   :  { %3141 = vmatpush3.msra.mxu0 %v3394_v3 }
 0xc1e   :  { %3152 = vmatprep.subr.mxu0 %v3344_v0 }
 0xcda   :  { %v1366_v37 = vpop.f32.mrf.mxu0 }
 0xcdb   :  { %v1367_v23 = vadd.f32 %v3450_v18, %v1366_v37 }
 0xcdc   :  { %v3130_v24 = vpop.f32.mrf.mxu0 }
 0xcdd   :  { %3286 = vtanh.f32 %v1367_v23  ;;  %v1732_v24 = vpop.permute.xlu0 %1731 }
 0xcea   :  { %v3287_v25 = vpop.eup %3286 }
 0xceb   :  { %v1376_v28 = vmul.f32 %v3287_v25, %v1374_v7 }
 0xced   :  { %v1377_v29 = vadd.f32 %v1376_v28, %v3429_v11 }
 0xcef   :  { %v1379_v44 = vadd.f32 %v1378_v31, %v1377_v29  ;;  %v1465_v47 = vadd.f32 %v1377_v29, %v1291_v19 }
 0xcf1   :  { %v1380_v27 = vadd.f32 %v1379_v44, %v3633_v6  ;;  %v1466_v48 = vmul.f32 3.0, %v1465_v47  ;;  %v1819_v47 = vpop.permute.xlu1 %1818 }
 0xcf3   :  { %v2896_v9 = vclamps-f32 %v1380_v27, 1.0  ;;  %v1467_v34 = vadd.f32 %v1466_v48, %v1205_v60 }
 0xcf5   :  { %v1383_v32 = vsel %vm36_vm1, %v2896_v9, %v1380_v27 }
 0xcf6   :  { %3136 = vmatmul.mubr.msk.f32.vlgmr.msra.gmra.mxu1 %vm53_vm2, %v1383_v32 }
 0xcf7   :  { %3146 = vmatpush3.msra.mxu1 %v3389_v2  ;;  %3149 = vmatprep.mubr.msk.f32.mxu1 %vm3345_vm0, %v3344_v0 }
 0xcf8   :  { %3147 = vmatprep.subr.mxu1 %v3344_v0 }
 0xcf9   :  { %3148 = vmatpush3.msra.mxu1 %v3394_v3 }
 0xcfa   :  { %3159 = vmatprep.subr.mxu1 %v3344_v0 }
 0xdb6   :  { %v1453_v11 = vpop.f32.mrf.mxu1 }
 0xdb7   :  { %v1454_v45 = vadd.f32 %v3450_v18, %v1453_v11 }
 0xdb8   :  { %v3137_v46 = vpop.f32.mrf.mxu1 }
 0xdb9   :  { %3288 = vtanh.f32 %v1454_v45 }
 0xdc6   :  { %v3289_v50 = vpop.eup %3288 }
 0xdc7   :  { %v1463_v53 = vmul.f32 %v3289_v50, %v1461_v52 }
 0xdc9   :  { %v1464_v30 = vadd.f32 %v1463_v53, %v3486_v38 }
 0xdcb   :  { %v1468_v49 = vadd.f32 %v1467_v34, %v1464_v30 }
 0xdcd   :  { %v1469_v54 = vmul.f32 0.125, %v1468_v49 }
 0xdcf   :  { %v3685_v55 = vadd.f32 %v1469_v54, %v3633_v6 }
 0xdd1   :  { %1471 = vst.msk [vmem:[#allocation2] sm:$0xff] %vm53_vm2, %v3685_v55  ;;  %v2898_v36 = vclamps-f32 %v3685_v55, 1.0 }
 0xdd3   :  { %v1482_v51 = vsel %vm36_vm1, %v2898_v36, %v3685_v55 }
 0xdd4   :  { %3143 = vmatmul.mubr.msk.f32.vlgmr.msra.gmra.mxu0 %vm53_vm2, %v1482_v51 }
 0xdd5   :  { %3153 = vmatpush3.msra.mxu0 %v3389_v2  ;;  %3156 = vmatprep.mubr.msk.f32.mxu0 %vm3345_vm0, %v3344_v0 }
 0xdd6   :  { %3154 = vmatprep.subr.mxu0 %v3344_v0 }
 0xdd7   :  { %3155 = vmatpush3.msra.mxu0 %v3394_v3 }
 0xdd8   :  { %3166 = vmatprep.subr.mxu0 %v3344_v0 }
 0xe94   :  { %v1552_v38 = vpop.f32.mrf.mxu0 }
 0xe95   :  { %v1553_v6 = vadd.f32 %v3450_v18, %v1552_v38  ;;  %v1919_v38 = vpop.permute.xlu0 %1918 }
 0xe96   :  { %v3144_v56 = vpop.f32.mrf.mxu0 }
 0xe97   :  { %3290 = vtanh.f32 %v1553_v6 }
 0xea4   :  { %v3291_v57 = vpop.eup %3290 }
 0xea5   :  { %v1562_v59 = vmul.f32 %v3291_v57, %v1560_v58 }
 0xea7   :  { %v1563_v60 = vadd.f32 %v1562_v59, %v3432_v12 }
 0xea9   :  { %v1564_v8 = vmul.f32 0.33333334, %v1563_v60 }
 0xeab   :  { %v1565_v61 = vadd.f32 %v1564_v8, %v3685_v55 }
 0xead   :  { %v2900_v62 = vclamps-f32 %v1565_v61, 1.0 }
 0xeaf   :  { %v1568_v63 = vsel %vm36_vm1, %v2900_v62, %v1565_v61 }
 0xeb0   :  { %3150 = vmatmul.mubr.msk.f32.vlgmr.msra.gmra.mxu1 %vm53_vm2, %v1568_v63  ;;  %v2005_v63 = vpop.permute.xlu1 %2004 }
 0xeb1   :  { %3160 = vmatpush3.msra.mxu1 %v3389_v2  ;;  %3163 = vmatprep.mubr.msk.f32.mxu1 %vm3345_vm0, %v3344_v0 }
 0xeb2   :  { %3161 = vmatprep.subr.mxu1 %v3344_v0 }
 0xeb3   :  { %3162 = vmatpush3.msra.mxu1 %v3394_v3 }
 0xeb4   :  { %3173 = vmatprep.subr.mxu1 %v3344_v0 }
 0xf70   :  { %v1638_v12 = vpop.f32.mrf.mxu1 }
 0xf71   :  { %v1639_v10 = vadd.f32 %v3450_v18, %v1638_v12 }
 0xf72   :  { %v3151_v33 = vpop.f32.mrf.mxu1 }
 0xf73   :  { %3292 = vtanh.f32 %v1639_v10 }
 0xf80   :  { %v3293_v1 = vpop.eup %3292 }
 0xf81   :  { %v1648_v5 = vmul.f32 %v3293_v1, %v1646_v4 }
 0xf83   :  { %v1649_v17 = vadd.f32 %v1648_v5, %v3489_v39 }
 0xf85   :  { %v1650_v19 = vsub.f32 %v1649_v17, %v1564_v8  ;;  %v1736_v28 = vsub.f32 %v1563_v60, %v1649_v17 }
 0xf87   :  { %v1651_v20 = vadd.f32 %v1650_v19, %v3685_v55 }
 0xf89   :  { %v2902_v35 = vclamps-f32 %v1651_v20, 1.0 }
 0xf8b   :  { %v1654_v21 = vsel %vm36_vm1, %v2902_v35, %v1651_v20  ;;  %v2091_v35 = vpop.permute.xlu0 %2090 }
 0xf8c   :  { %3157 = vmatmul.mubr.msk.f32.vlgmr.msra.gmra.mxu0 %vm53_vm2, %v1654_v21 }
 0xf8d   :  { %3167 = vmatpush3.msra.mxu0 %v3389_v2  ;;  %3170 = vmatprep.mubr.msk.f32.mxu0 %vm3345_vm0, %v3344_v0 }
 0xf8e   :  { %3168 = vmatprep.subr.mxu0 %v3344_v0 }
 0xf8f   :  { %3169 = vmatpush3.msra.mxu0 %v3394_v3 }
 0xf90   :  { %3180 = vmatprep.subr.mxu0 %v3344_v0 }
0x104c   :  { %v1724_v39 = vpop.f32.mrf.mxu0 }
0x104d   :  { %v1725_v22 = vadd.f32 %v3450_v18, %v1724_v39 }
0x104e   :  { %v3158_v37 = vpop.f32.mrf.mxu0 }
0x104f   :  { %3294 = vtanh.f32 %v1725_v22 }
0x105c   :  { %v3295_v23 = vpop.eup %3294 }
0x105d   :  { %v1734_v25 = vmul.f32 %v3295_v23, %v1732_v24 }
0x105f   :  { %v1735_v7 = vadd.f32 %v1734_v25, %v3435_v13 }
0x1061   :  { %v1737_v29 = vadd.f32 %v1736_v28, %v1735_v7  ;;  %v1823_v11 = vadd.f32 %v1735_v7, %v1649_v17 }
0x1063   :  { %v1738_v31 = vadd.f32 %v1737_v29, %v3685_v55  ;;  %v1824_v45 = vmul.f32 3.0, %v1823_v11 }
0x1065   :  { %v2904_v44 = vclamps-f32 %v1738_v31, 1.0  ;;  %v1825_v50 = vadd.f32 %v1824_v45, %v1563_v60 }
0x1067   :  { %v1741_v27 = vsel %vm36_vm1, %v2904_v44, %v1738_v31  ;;  %v2178_v44 = vpop.permute.xlu1 %2177 }
0x1068   :  { %3164 = vmatmul.mubr.msk.f32.vlgmr.msra.gmra.mxu1 %vm53_vm2, %v1741_v27 }
0x1069   :  { %3174 = vmatpush3.msra.mxu1 %v3389_v2  ;;  %3177 = vmatprep.mubr.msk.f32.mxu1 %vm3345_vm0, %v3344_v0 }
0x106a   :  { %3175 = vmatprep.subr.mxu1 %v3344_v0 }
0x106b   :  { %3176 = vmatpush3.msra.mxu1 %v3394_v3 }
0x106c   :  { %3187 = vmatprep.subr.mxu1 %v3344_v0 }
0x1128   :  { %v1811_v13 = vpop.f32.mrf.mxu1 }
0x1129   :  { %v1812_v9 = vadd.f32 %v3450_v18, %v1811_v13 }
0x112a   :  { %v3165_v32 = vpop.f32.mrf.mxu1 }
0x112b   :  { %3296 = vtanh.f32 %v1812_v9 }
0x1138   :  { %v3297_v46 = vpop.eup %3296 }
0x1139   :  { %v1821_v48 = vmul.f32 %v3297_v46, %v1819_v47 }
0x113b   :  { %v1822_v52 = vadd.f32 %v1821_v48, %v3492_v40 }
0x113d   :  { %v1826_v53 = vadd.f32 %v1825_v50, %v1822_v52 }
0x113f   :  { %v1827_v34 = vmul.f32 0.125, %v1826_v53 }
0x1141   :  { %v3739_v30 = vadd.f32 %v1827_v34, %v3685_v55  ;;  %v2278_v34 = vpop.permute.xlu0 %2277 }
0x1143   :  { %1830 = vst.msk [vmem:[#allocation2 + $0x8] sm:$0xff] %vm53_vm2, %v3739_v30  ;;  %v2906_v49 = vclamps-f32 %v3739_v30, 1.0 }
0x1145   :  { %v1841_v54 = vsel %vm36_vm1, %v2906_v49, %v3739_v30 }
0x1146   :  { %3171 = vmatmul.mubr.msk.f32.vlgmr.msra.gmra.mxu0 %vm53_vm2, %v1841_v54 }
0x1147   :  { %3181 = vmatpush3.msra.mxu0 %v3389_v2  ;;  %3184 = vmatprep.mubr.msk.f32.mxu0 %vm3345_vm0, %v3344_v0 }
0x1148   :  { %3182 = vmatprep.subr.mxu0 %v3344_v0 }
0x1149   :  { %3183 = vmatpush3.msra.mxu0 %v3394_v3 }
0x114a   :  { %3194 = vmatprep.subr.mxu0 %v3344_v0 }
0x1206   :  { %v1911_v40 = vpop.f32.mrf.mxu0 }
0x1207   :  { %v1912_v55 = vadd.f32 %v3450_v18, %v1911_v40 }
0x1208   :  { %v3172_v36 = vpop.f32.mrf.mxu0 }
0x1209   :  { %3298 = vtanh.f32 %v1912_v55 }
0x1216   :  { %v3299_v51 = vpop.eup %3298 }
0x1217   :  { %v1921_v6 = vmul.f32 %v3299_v51, %v1919_v38 }
0x1219   :  { %v1922_v56 = vadd.f32 %v1921_v6, %v3438_v14 }
0x121b   :  { %v1923_v57 = vmul.f32 0.33333334, %v1922_v56 }
0x121d   :  { %v1924_v58 = vadd.f32 %v1923_v57, %v3739_v30 }
0x121f   :  { %v2908_v59 = vclamps-f32 %v1924_v58, 1.0 }
0x1221   :  { %v1927_v60 = vsel %vm36_vm1, %v2908_v59, %v1924_v58 }
0x1222   :  { %3178 = vmatmul.mubr.msk.f32.vlgmr.msra.gmra.mxu1 %vm53_vm2, %v1927_v60 }
0x1223   :  { %3188 = vmatpush3.msra.mxu1 %v3389_v2  ;;  %3191 = vmatprep.mubr.msk.f32.mxu1 %vm3345_vm0, %v3344_v0 }
0x1224   :  { %3189 = vmatprep.subr.mxu1 %v3344_v0 }
0x1225   :  { %3190 = vmatpush3.msra.mxu1 %v3394_v3 }
0x1226   :  { %3201 = vmatprep.subr.mxu1 %v3344_v0 }
0x12e2   :  { %v1997_v14 = vpop.f32.mrf.mxu1 }
0x12e3   :  { %v1998_v8 = vadd.f32 %v3450_v18, %v1997_v14 }
0x12e4   :  { %v3179_v61 = vpop.f32.mrf.mxu1 }
0x12e5   :  { %3300 = vtanh.f32 %v1998_v8  ;;  %v2550_v8 = vld [vmem:[%s3896_s3 + $0x8] sm:$0xff] }
0x12f2   :  { %v3301_v62 = vpop.eup %3300 }
0x12f3   :  { %v2007_v12 = vmul.f32 %v3301_v62, %v2005_v63  ;;  %v2549_v62 = vld [vmem:[%s3896_s3] sm:$0xff] }
0x12f5   :  { %v2008_v10 = vadd.f32 %v2007_v12, %v3495_v41 }
0x12f7   :  { %v2009_v33 = vsub.f32 %v2008_v10, %v1923_v57  ;;  %v2095_v22 = vsub.f32 %v1922_v56, %v2008_v10 }
0x12f9   :  { %v2010_v1 = vadd.f32 %v2009_v33, %v3739_v30 }
0x12fb   :  { %v2910_v4 = vclamps-f32 %v2010_v1, 1.0 }
0x12fd   :  { %v2013_v5 = vsel %vm36_vm1, %v2910_v4, %v2010_v1  ;;  %v2922_v1 = vld [vmem:[%s3897_s4] ss:$0 sm:$0xff] }
0x12fe   :  { %3185 = vmatmul.mubr.msk.f32.vlgmr.msra.gmra.mxu0 %vm53_vm2, %v2013_v5 }
0x12ff   :  { %3195 = vmatpush3.msra.mxu0 %v3389_v2  ;;  %3198 = vmatprep.mubr.msk.f32.mxu0 %vm3345_vm0, %v3344_v0 }
0x1300   :  { %3196 = vmatprep.subr.mxu0 %v3344_v0 }
0x1301   :  { %3197 = vmatpush3.msra.mxu0 %v3394_v3 }
0x1302   :  { %3208 = vmatprep.subr.mxu0 %v3344_v0 }
0x13be   :  { %v2083_v41 = vpop.f32.mrf.mxu0 }
0x13bf   :  { %v2084_v17 = vadd.f32 %v3450_v18, %v2083_v41 }
0x13c0   :  { %v3186_v19 = vpop.f32.mrf.mxu0 }
0x13c1   :  { %3302 = vtanh.f32 %v2084_v17 }
0x13ce   :  { %v3303_v20 = vpop.eup %3302 }
0x13cf   :  { %v2093_v21 = vmul.f32 %v3303_v20, %v2091_v35 }
0x13d1   :  { %v2094_v39 = vadd.f32 %v2093_v21, %v3441_v15  ;;  %v3314_v15 = vld [vmem:[%s3894_s1] sm:$0xff]  ;;  %v2450_v21 = vpop.permute.xlu0 %2449 }
0x13d3   :  { %v2096_v37 = vadd.f32 %v2095_v22, %v2094_v39  ;;  %v2182_v29 = vadd.f32 %v2094_v39, %v2008_v10  ;;  %v3317_v22 = vld [vmem:[#allocation3 + $0xd0] sm:$0xff] }
0x13d5   :  { %v2097_v23 = vadd.f32 %v2096_v37, %v3739_v30  ;;  %v2183_v31 = vmul.f32 3.0, %v2182_v29 }
0x13d7   :  { %v2912_v24 = vclamps-f32 %v2097_v23, 1.0  ;;  %v2184_v13 = vadd.f32 %v2183_v31, %v1922_v56  ;;  %v2364_v56 = vpop.permute.xlu1 %2363 }
0x13d9   :  { %v2100_v3 = vsel %vm36_vm1, %v2912_v24, %v2097_v23 }
0x13da   :  { %3192 = vmatmul.mubr.msk.f32.vlgmr.msra.gmra.mxu1 %vm53_vm2, %v2100_v3 }
0x13db   :  { %3202 = vmatpush3.msra.mxu1 %v3389_v2  ;;  %3205 = vmatprep.mubr.msk.f32.mxu1 %vm3345_vm0, %v3344_v0 }
0x13dc   :  { %3203 = vmatprep.subr.mxu1 %v3344_v0 }
0x13dd   :  { %3204 = vmatpush3.msra.mxu1 %v3314_v15 }
0x13de   :  { %3215 = vmatprep.subr.mxu1 %v3344_v0 }
0x149a   :  { %v2170_v25 = vpop.f32.mrf.mxu1 }
0x149b   :  { %v2171_v7 = vadd.f32 %v3450_v18, %v2170_v25 }
0x149c   :  { %v3193_v28 = vpop.f32.mrf.mxu1 }
0x149d   :  { %3304 = vtanh.f32 %v2171_v7  ;;  %v2634_v7 = vld [vmem:[#allocation2 + $0x8] sm:$0xff] }
0x14aa   :  { %v3305_v2 = vpop.eup %3304 }
0x14ab   :  { %v2180_v27 = vmul.f32 %v3305_v2, %v2178_v44 }
0x14ad   :  { %v2181_v9 = vadd.f32 %v2180_v27, %v3498_v42  ;;  %v3315_v42 = vld [vmem:[%s3894_s1 + $0x8] sm:$0xff] }
0x14af   :  { %v2185_v32 = vadd.f32 %v2184_v13, %v2181_v9 }
0x14b1   :  { %v2186_v11 = vmul.f32 0.125, %v2185_v32  ;;  %v2537_v32 = vpop.permute.xlu1 %2536 }
0x14b3   :  { %v3795_v45 = vadd.f32 %v2186_v11, %v3739_v30 }
0x14b5   :  { %2189 = vst.msk [vmem:[#allocation2 + $0x10] sm:$0xff] %vm53_vm2, %v3795_v45  ;;  %v2914_v46 = vclamps-f32 %v3795_v45, 1.0 }
0x14b7   :  { %v2200_v47 = vsel %vm36_vm1, %v2914_v46, %v3795_v45  ;;  %v3318_v46 = vld [vmem:[#allocation3 + $0xd8] sm:$0xff] }
0x14b8   :  { %3199 = vmatmul.mubr.msk.f32.vlgmr.msra.gmra.mxu0 %vm53_vm2, %v2200_v47 }
0x14b9   :  { %3209 = vmatpush3.msra.mxu0 %v3315_v42  ;;  %3212 = vmatprep.mubr.msk.f32.mxu0 %vm3345_vm0, %v3344_v0 }
0x14ba   :  { %3210 = vmatprep.subr.mxu0 %v3344_v0 }
0x14bb   :  { %3211 = vmatpush3.msra.mxu0 %v3314_v15 }
0x14bc   :  { %3222 = vmatprep.subr.mxu0 %v3344_v0  ;;  %v2710_v63 = vld [vmem:[#allocation2 + $0x10] sm:$0xff] }
0x1578   :  { %v2270_v48 = vpop.f32.mrf.mxu0 }
0x1579   :  { %v2271_v50 = vadd.f32 %v3450_v18, %v2270_v48  ;;  %v3827_v18 = vld [vmem:[%s3895_s2] ss:$0 sm:$0xff] }
0x157a   :  { %v3200_v52 = vpop.f32.mrf.mxu0 }
0x157b   :  { %3306 = vtanh.f32 %v2271_v50 }
0x1588   :  { %v3307_v53 = vpop.eup %3306 }
0x1589   :  { %v2280_v30 = vmul.f32 %v3307_v53, %v2278_v34 }
0x158b   :  { %v3813_v49 = vadd.f32 %v2280_v30, %v3444_v16 }
0x158d   :  { %v2282_v54 = vmul.f32 0.33333334, %v3813_v49 }
0x158f   :  { %v2283_v40 = vadd.f32 %v2282_v54, %v3795_v45 }
0x1591   :  { %v2916_v55 = vclamps-f32 %v2283_v40, 1.0 }
0x1593   :  { %v2286_v36 = vsel %vm36_vm1, %v2916_v55, %v2283_v40 }
0x1594   :  { %3206 = vmatmul.mubr.msk.f32.vlgmr.msra.gmra.mxu1 %vm53_vm2, %v2286_v36 }
0x1595   :  { %3216 = vmatpush3.msra.mxu1 %v3315_v42  ;;  %3219 = vmatprep.mubr.msk.f32.mxu1 %vm3345_vm0, %v3344_v0 }
0x1596   :  { %3217 = vmatprep.subr.mxu1 %v3344_v0 }
0x1597   :  { %3218 = vmatpush3.msra.mxu1 %v3314_v15 }
0x1598   :  { %3229 = vmatprep.subr.mxu1 %v3344_v0 }
0x1654   :  { %v2356_v16 = vpop.f32.mrf.mxu1 }
0x1655   :  { %v2357_v51 = vadd.f32 %v3827_v18, %v2356_v16 }
0x1656   :  { %v3207_v38 = vpop.f32.mrf.mxu1 }
0x1657   :  { %3308 = vtanh.f32 %v2357_v51 }
0x1664   :  { %v3309_v6 = vpop.eup %3308 }
0x1665   :  { %v2366_v57 = vmul.f32 %v3309_v6, %v2364_v56 }
0x1667   :  { %v3831_v58 = vadd.f32 %v2366_v57, %v3501_v43  ;;  %v2552_v43 = vld [vmem:[#allocation2] sm:$0xff] }
0x1669   :  { %v2368_v59 = vsub.f32 %v3831_v58, %v2282_v54  ;;  %v2454_v23 = vsub.f32 %v3813_v49, %v3831_v58 }
0x166b   :  { %v2369_v60 = vadd.f32 %v2368_v59, %v3795_v45 }
0x166d   :  { %v2918_v14 = vclamps-f32 %v2369_v60, 1.0 }
0x166f   :  { %v2372_v61 = vsel %vm36_vm1, %v2918_v14, %v2369_v60 }
0x1670   :  { %3213 = vmatmul.mubr.msk.f32.vlgmr.msra.gmra.mxu0 %vm53_vm2, %v2372_v61 }
0x1671   :  { %3223 = vmatpush3.msra.mxu0 %v2550_v8  ;;  %3226 = vmatprep.mubr.msk.f32.mxu0 %vm3345_vm0, %v3344_v0 }
0x1672   :  { %3224 = vmatprep.subr.mxu0 %v3344_v0 }
0x1673   :  { %3225 = vmatpush3.msra.mxu0 %v2549_v62 }
0x1674   :  { %3227 = vmatmul.mubr.msk.f32.vlgmr.msra.gmra.mxu0 %vm53_vm2, %v2552_v43  ;;  %3236 = vmatprep.subr.mxu0 %v3344_v0 }
0x1675   :  { %3237 = vmatpush3.msra.mxu0 %v2550_v8  ;;  %3240 = vmatprep.mubr.msk.f32.mxu0 %vm3345_vm0, %v3344_v0 }
0x1676   :  { %3238 = vmatprep.subr.mxu0 %v3344_v0 }
0x1677   :  { %3239 = vmatpush3.msra.mxu0 %v2549_v62 }
0x1678   :  { %3241 = vmatmul.mubr.msk.f32.vlgmr.msra.gmra.mxu0 %vm53_vm2, %v2710_v63 }
0x1730   :  { %v2442_v12 = vpop.f32.mrf.mxu0 }
0x1731   :  { %v2443_v10 = vadd.f32 %v3827_v18, %v2442_v12 }
0x1732   :  { %v3214_v33 = vpop.f32.mrf.mxu0 }
0x1733   :  { %3310 = vtanh.f32 %v2443_v10 }
0x1734   :  { %v2628_v4 = vpop.f32.mrf.mxu0 }
0x1735   :  { %v2629_v5 = vadd.f32 %v2922_v1, %v2628_v4 }
0x1736   :  { %v3228_v41 = vpop.f32.mrf.mxu0 }
0x1737   :  { %2633 = vst.msk [vmem:[%s3898_s5] sm:$0xff] %vm2632_vm3, %v2629_v5 }
0x1738   :  { %v2780_v17 = vpop.f32.mrf.mxu0 }
0x1739   :  { %v2781_v19 = vadd.f32 %v2922_v1, %v2780_v17 }
0x173a   :  { %v3242_v20 = vpop.f32.mrf.mxu0 }
0x173b   :  { %2927 = vst.msk [vmem:[%s3898_s5 + $0x10] sm:$0xff] %vm2632_vm3, %v2781_v19 }
0x1740   :  { %v3311_v35 = vpop.eup %3310 }
0x1741   :  { %v2452_v39 = vmul.f32 %v3311_v35, %v2450_v21 }
0x1743   :  { %v2453_v37 = vadd.f32 %v3317_v22, %v2452_v39 }
0x1745   :  { %v2455_v24 = vadd.f32 %v2454_v23, %v2453_v37  ;;  %v2541_v27 = vadd.f32 %v2453_v37, %v3831_v58 }
0x1747   :  { %v2456_v3 = vadd.f32 %v2455_v24, %v3795_v45  ;;  %v2542_v13 = vmul.f32 3.0, %v2541_v27 }
0x1749   :  { %v2920_v15 = vclamps-f32 %v2456_v3, 1.0  ;;  %v2543_v11 = vadd.f32 %v2542_v13, %v3813_v49 }
0x174b   :  { %v2459_v25 = vsel %vm36_vm1, %v2920_v15, %v2456_v3 }
0x174c   :  { %3220 = vmatmul.mubr.msk.f32.vlgmr.msra.gmra.mxu1 %vm53_vm2, %v2459_v25 }
0x174d   :  { %3230 = vmatpush3.msra.mxu1 %v2550_v8  ;;  %3233 = vmatprep.mubr.msk.f32.mxu1 %vm3345_vm0, %v3344_v0 }
0x174e   :  { %3231 = vmatprep.subr.mxu1 %v3344_v0 }
0x174f   :  { %3232 = vmatpush3.msra.mxu1 %v2549_v62 }
0x1750   :  { %3234 = vmatmul.mubr.msk.f32.vlgmr.msra.gmra.mxu1 %vm53_vm2, %v2634_v7  ;;  %3243 = vmatprep.subr.mxu1 %v3344_v0 }
0x1751   :  { %3244 = vmatpush3.msra.mxu1 %v2550_v8  ;;  %3247 = vmatprep.mubr.msk.f32.mxu1 %vm3345_vm0, %v3344_v0 }
0x1752   :  { %3245 = vmatprep.subr.mxu1 %v3344_v0 }
0x1753   :  { %3246 = vmatpush3.msra.mxu1 %v2549_v62 }
0x180c   :  { %v2529_v26 = vpop.f32.mrf.mxu1 }
0x180d   :  { %v2530_v28 = vadd.f32 %v3827_v18, %v2529_v26 }
0x180e   :  { %v3221_v29 = vpop.f32.mrf.mxu1 }
0x180f   :  { %3312 = vtanh.f32 %v2530_v28 }
0x1810   :  { %v2704_v31 = vpop.f32.mrf.mxu1 }
0x1811   :  { %v2705_v2 = vadd.f32 %v2922_v1, %v2704_v31 }
0x1812   :  { %v3235_v44 = vpop.f32.mrf.mxu1 }
0x1813   :  { %2925 = vst.msk [vmem:[%s3898_s5 + $0x8] sm:$0xff] %vm2632_vm3, %v2705_v2 }
0x181c   :  { %v3313_v9 = vpop.eup %3312 }
0x181d   :  { %v2539_v0 = vmul.f32 %v3313_v9, %v2537_v32 }
0x181f   :  { %v2540_v47 = vadd.f32 %v3318_v46, %v2539_v0 }
0x1821   :  { %v2544_v42 = vadd.f32 %v2543_v11, %v2540_v47 }
0x1823   :  { %v2545_v48 = vmul.f32 0.125, %v2544_v42 }
0x1825   :  { %v2546_v50 = vadd.f32 %v2545_v48, %v3795_v45 }
0x1827   :  { %2548 = vst.msk [vmem:[#allocation2 + $0x18] sm:$0xff] %vm53_vm2, %v2546_v50 }
0x182e   :  { %v2786_v52 = vld [vmem:[#allocation2 + $0x18] sm:$0xff] }
0x182f   :  { %3248 = vmatmul.mubr.msk.f32.vlgmr.msra.gmra.mxu1 %vm53_vm2, %v2786_v52 }
0x18ef   :  { %v2856_v53 = vpop.f32.mrf.mxu1 }
0x18f0   :  { %v2857_v34 = vadd.f32 %v2922_v1, %v2856_v53 }
0x18f1   :  { %v3249_v30 = vpop.f32.mrf.mxu1 }
0x18f2   :  { %2929 = vst.msk [vmem:[%s3898_s5 + $0x18] sm:$0xff] %vm2632_vm3, %v2857_v34 }
0x18f3   :  { %2866 = vsyncpa [#allocation4], 1 }

</bundles_post_ra>
